<compile_context>
chip_gen: v5e
topology: v5e:2x2
jax: 0.10.0
libtpu: 0.0.40
codegen_flags: <defaults>
</compile_context>

<pallas_src>
import functools

import jax
import jax.numpy as jnp
from jax import lax
from jax.experimental import pallas as pl
from jax.experimental.pallas import tpu as pltpu


def _round_up(x, m):
    return (x + m - 1) // m * m


def _largest_divisor_leq(n, cap):
    cap = max(1, min(n, cap))
    for d in range(cap, 0, -1):
        if n % d == 0:
            return d
    return 1


def _pick_m_tile(m, cap_rows=2048):
    """Largest tile of the flattened M axis that divides m, is sublane-friendly
    (multiple of 8) and at most cap_rows.  Falls back to the full axis."""
    if m <= cap_rows:
        return m
    for t in range(cap_rows, 0, -1):
        if m % t == 0 and t % 8 == 0:
            return t
    return m


# ---------------- sweep 1: conv (per-tap MXU matmuls) + bias + channel stats ------------
def _conv_stats_kernel(xp_ref, w_ref, b_ref, y_ref, stats_ref, *,
                       ksize, th, wout, cin_p, cout_p):
    rb = pl.program_id(1)

    # stats accumulator: the same (1, 2, cout_p) block is revisited across the
    # rb ("arbitrary") axis -> zero it at the first row-block of every image.
    @pl.when(rb == 0)
    def _init():
        stats_ref[...] = jnp.zeros_like(stats_ref)

    row0 = pl.multiple_of(rb * th, th)
    tm = th * wout

    acc = jnp.zeros((tm, cout_p), jnp.float32)
    # In-VMEM im2col: K*K shifted slices of the resident padded image tile.
    for kh in range(ksize):
        for kw in range(ksize):
            xs = xp_ref[0, pl.ds(row0 + kh, th), pl.ds(kw, wout), :]   # (th, wout, cin_p) f32
            xs2 = xs.reshape(tm, cin_p).astype(jnp.bfloat16)
            acc = acc + jnp.dot(xs2, w_ref[kh, kw],
                                preferred_element_type=jnp.float32)   # MXU, f32 accum
    acc = acc + b_ref[...]                                            # conv bias

    y_ref[0] = acc                                                    # (tm, cout_p)

    # per-channel partial sums for BatchNorm batch statistics
    s = jnp.sum(acc, axis=0, keepdims=True)            # (1, cout_p)
    ss = jnp.sum(acc * acc, axis=0, keepdims=True)     # (1, cout_p)
    stats_ref[0] = stats_ref[0] + jnp.concatenate([s, ss], axis=0)


# ---------------- sweep 2: folded BN (single FMA) + ReLU --------------------------------
def _bn_act_kernel(y_ref, sc_ref, sh_ref, o_ref, *, apply_relu):
    o = y_ref[...] * sc_ref[...] + sh_ref[...]         # (1, tm2, cout_p) f32
    if apply_relu:
        o = jnp.maximum(o, 0.0)
    o_ref[...] = o


def conv_block_forward(x, weight, bias, gamma, beta, *, kernel=3, stride=1,
                       activation=True, eps=1e-5, row_block=8):
    """x: (N, Cin, H, W) f32; weight: (Cout, Cin, K, K) (PyTorch OIHW)."""
    if stride != 1:
        # TODO(synk): stride > 1 not implemented in the Pallas path (module default is 1).
        raise NotImplementedError("stride != 1 is not supported by this kernel")

    N, Cin, H, W = x.shape
    Cout = weight.shape[0]
    pad = kernel // 2
    Hout = H + 2 * pad - kernel + 1
    Wout = W + 2 * pad - kernel + 1
    M_img = Hout * Wout

    cout_p = _round_up(Cout, 128)          # lane-dense output channels
    cin_p = _round_up(Cin, 16)             # bf16-friendly contraction tiling

    # Conv sweep: row-block over Hout; keep the M tile MXU-native (~128 rows)
    # and sublane-aligned.
    th = _largest_divisor_leq(Hout, row_block)
    if (th * Wout) % 8 != 0:
        th = Hout                           # full-extent block is always legal
    n_rb = Hout // th
    tm = th * Wout

    # ---- glue: NCHW -> padded NHWC (zero pad spatial + channel) ----
    x_nhwc = jnp.transpose(x, (0, 2, 3, 1))
    xp = jnp.pad(x_nhwc, ((0, 0), (pad, pad), (pad, pad), (0, cin_p - Cin)))
    Hp, Wp = H + 2 * pad, W + 2 * pad

    # weight OIHW -> (kh, kw, cin_p, cout_p) bf16, zero-padded
    w_kkio = jnp.transpose(weight, (2, 3, 1, 0)).astype(jnp.bfloat16)
    w_p = jnp.zeros((kernel, kernel, cin_p, cout_p), jnp.bfloat16)
    w_p = w_p.at[:, :, :Cin, :Cout].set(w_kkio)
    b_p = jnp.zeros((1, cout_p), jnp.float32).at[0, :Cout].set(bias)
    g_p = jnp.zeros((cout_p,), jnp.float32).at[:Cout].set(gamma)
    be_p = jnp.zeros((cout_p,), jnp.float32).at[:Cout].set(beta)

    kkc = kernel * kernel * cin_p
    cparams_s1 = pltpu.CompilerParams(
        dimension_semantics=("parallel", "arbitrary"),
        vmem_limit_bytes=32 * 1024 * 1024)
    cparams_s2 = pltpu.CompilerParams(
        dimension_semantics=("parallel", "parallel"),
        vmem_limit_bytes=32 * 1024 * 1024)

    # ---- sweep 1: conv + bias + per-channel sum / sumsq ----
    y1, stats = pl.pallas_call(
        functools.partial(_conv_stats_kernel, ksize=kernel, th=th, wout=Wout,
                          cin_p=cin_p, cout_p=cout_p),
        out_shape=(jax.ShapeDtypeStruct((N, M_img, cout_p), jnp.float32),
                   jax.ShapeDtypeStruct((N, 2, cout_p), jnp.float32)),
        grid_spec=pltpu.PrefetchScalarGridSpec(
            num_scalar_prefetch=0, grid=(N, n_rb),
            in_specs=[
                pl.BlockSpec((1, Hp, Wp, cin_p), lambda n, rb: (n, 0, 0, 0)),
                pl.BlockSpec((kernel, kernel, cin_p, cout_p),
                             lambda n, rb: (0, 0, 0, 0)),
                pl.BlockSpec((1, cout_p), lambda n, rb: (0, 0)),
            ],
            out_specs=(
                pl.BlockSpec((1, tm, cout_p), lambda n, rb: (n, rb, 0)),
                pl.BlockSpec((1, 2, cout_p), lambda n, rb: (n, 0, 0)),
            )),
        compiler_params=cparams_s1,
        cost_estimate=pl.CostEstimate(
            flops=2 * N * M_img * kkc * cout_p,
            transcendentals=0,
            bytes_accessed=(xp.size * 4 + w_p.size * 2
                            + N * M_img * cout_p * 4 + N * 2 * cout_p * 4)),
    )(xp, w_p, b_p)

    # ---- tiny per-channel glue: batch stats -> folded scale/shift ----
    m_total = N * M_img
    tot = jnp.sum(stats[:, 0, :], axis=0)
    tot2 = jnp.sum(stats[:, 1, :], axis=0)
    mean = tot / m_total
    var = jnp.maximum(tot2 / m_total - mean * mean, 0.0)   # biased variance (train mode)
    scale = g_p * lax.rsqrt(var + eps)
    shift = be_p - mean * scale
    scale2 = scale.reshape(1, cout_p)
    shift2 = shift.reshape(1, cout_p)

    # ---- sweep 2: normalize (single FMA) + ReLU on big lane-dense tiles ----
    tm2 = _pick_m_tile(M_img)
    n_mb = M_img // tm2
    out2 = pl.pallas_call(
        functools.partial(_bn_act_kernel, apply_relu=activation),
        out_shape=jax.ShapeDtypeStruct((N, M_img, cout_p), jnp.float32),
        grid_spec=pltpu.PrefetchScalarGridSpec(
            num_scalar_prefetch=0, grid=(N, n_mb),
            in_specs=[
                pl.BlockSpec((1, tm2, cout_p), lambda n, mb: (n, mb, 0)),
                pl.BlockSpec((1, cout_p), lambda n, mb: (0, 0)),
                pl.BlockSpec((1, cout_p), lambda n, mb: (0, 0)),
            ],
            out_specs=pl.BlockSpec((1, tm2, cout_p), lambda n, mb: (n, mb, 0))),
        compiler_params=cparams_s2,
        input_output_aliases={0: 0},          # overwrite the conv intermediate in place
        cost_estimate=pl.CostEstimate(
            flops=2 * N * M_img * cout_p, transcendentals=0,
            bytes_accessed=2 * N * M_img * cout_p * 4 + 2 * cout_p * 4),
    )(y1, scale2, shift2)

    # ---- glue: drop channel padding, back to NCHW ----
    out_nhwc = out2.reshape(N, Hout, Wout, cout_p)[..., :Cout]
    return jnp.transpose(out_nhwc, (0, 3, 1, 2))


def _reference_forward(x, weight, bias, gamma, beta, *, kernel=3, stride=1,
                       activation=True, eps=1e-5):
    pad = kernel // 2
    out = lax.conv_general_dilated(
        x, weight, window_strides=(stride, stride),
        padding=[(pad, pad), (pad, pad)],
        dimension_numbers=("NCHW", "OIHW", "NCHW"))
    out = out + bias[None, :, None, None]
    mean = out.mean(axis=(0, 2, 3), keepdims=True)
    var = jnp.square(out - mean).mean(axis=(0, 2, 3), keepdims=True)
    out = (out - mean) * lax.rsqrt(var + eps)
    out = out * gamma[None, :, None, None] + beta[None, :, None, None]
    if activation:
        out = jnp.maximum(out, 0.0)
    return out


if __name__ == "__main__":
    # conv_block(in_map=4, out_map=8, kernel=3, stride=1, activation=True)
    N, Cin, H, W = 2, 4, 16, 16
    Cout, K, stride = 8, 3, 1

    key = jax.random.PRNGKey(0)
    kx, kw, kb, kg, kbe = jax.random.split(key, 5)
    x = jax.random.normal(kx, (N, Cin, H, W), jnp.float32)
    weight = jax.random.normal(kw, (Cout, Cin, K, K), jnp.float32) * 0.1
    bias = jax.random.normal(kb, (Cout,), jnp.float32) * 0.1
    gamma = 1.0 + 0.1 * jax.random.normal(kg, (Cout,), jnp.float32)
    beta = 0.1 * jax.random.normal(kbe, (Cout,), jnp.float32)

    fwd = jax.jit(functools.partial(conv_block_forward, kernel=K, stride=stride,
                                    activation=True))
    out = jax.block_until_ready(fwd(x, weight, bias, gamma, beta))

    ref = _reference_forward(x, weight, bias, gamma, beta,
                             kernel=K, stride=stride, activation=True)
    assert out.shape == (N, Cout, H, W), out.shape
    max_err = float(jnp.max(jnp.abs(out - ref)))
    assert jnp.allclose(out, ref, atol=2e-2, rtol=2e-2), max_err
    print("KERNEL_OK")
</pallas_src>

<mosaic_0001>
module attributes {stable_mosaic.version = 11 : i64} {
  func.func @_conv_stats_kernel(%arg0: i32, %arg1: i32, %arg2: memref<1x18x18x16xf32, #tpu.memory_space<vmem>>, %arg3: memref<3x3x16x128xbf16, #tpu.memory_space<vmem>>, %arg4: memref<1x128xf32, #tpu.memory_space<vmem>>, %arg5: memref<1x128x128xf32, #tpu.memory_space<vmem>>, %arg6: memref<1x2x128xf32, #tpu.memory_space<vmem>>) attributes {dimension_semantics = [#tpu.dimension_semantics<parallel>, #tpu.dimension_semantics<arbitrary>], iteration_bounds = array<i64: 2, 2>, scalar_prefetch = 0 : i64, scratch_operands = 0 : i64, tpu.core_type = #tpu.core_type<tc>, window_params = [{transform_indices = @transform_0, window_bounds = array<i64: 1, 18, 18, 16>}, {pipeline_mode = #tpu.pipeline_mode<synchronous>, transform_indices = @transform_1, window_bounds = array<i64: 3, 3, 16, 128>}, {pipeline_mode = #tpu.pipeline_mode<synchronous>, transform_indices = @transform_2, window_bounds = array<i64: 1, 128>}, {transform_indices = @transform_3, window_bounds = array<i64: 1, 128, 128>}, {transform_indices = @transform_4, window_bounds = array<i64: 1, 2, 128>}]} {
    %c0_i32 = arith.constant 0 : i32
    %0 = arith.cmpi eq, %arg1, %c0_i32 : i32
    %1 = arith.extui %0 : i1 to i32
    %c0_i32_0 = arith.constant 0 : i32
    %2 = arith.cmpi ne, %1, %c0_i32_0 : i32
    scf.if %2 {
      %cst_90 = arith.constant 0.000000e+00 : f32
      %114 = vector.broadcast %cst_90 : f32 to vector<1x2x128xf32>
      %c0_91 = arith.constant 0 : index
      %c0_92 = arith.constant 0 : index
      %c0_93 = arith.constant 0 : index
      %115 = vector.load %arg6[%c0_91, %c0_92, %c0_93] : memref<1x2x128xf32, #tpu.memory_space<vmem>>, vector<1x2x128xf32>
      tpu.vector_store %arg6[%c0_91, %c0_92, %c0_93], %114 {strides = array<i32>} : memref<1x2x128xf32, #tpu.memory_space<vmem>>, vector<1x2x128xf32>,
    } else {
    }
    %c8_i32 = arith.constant 8 : i32
    %3 = arith.muli %arg1, %c8_i32 : i32
    %4 = tpu.assume_multiple %3, 8 : i32
    %cst = arith.constant 0.000000e+00 : f32
    %5 = vector.broadcast %cst : f32 to vector<128x128xf32>
    %c0_i32_1 = arith.constant 0 : i32
    %6 = arith.addi %4, %c0_i32_1 : i32
    %c0 = arith.constant 0 : index
    %7 = arith.index_cast %6 : i32 to index
    %c0_2 = arith.constant 0 : index
    %c0_3 = arith.constant 0 : index
    %8 = vector.load %arg2[%c0, %7, %c0_2, %c0_3] : memref<1x18x18x16xf32, #tpu.memory_space<vmem>>, vector<1x8x16x16xf32>
    %9 = vector.shape_cast %8 : vector<1x8x16x16xf32> to vector<8x16x16xf32>
    %10 = vector.shape_cast %9 : vector<8x16x16xf32> to vector<128x16xf32>
    %11 = arith.truncf %10 : vector<128x16xf32> to vector<128x16xbf16>
    %c0_4 = arith.constant 0 : index
    %c0_5 = arith.constant 0 : index
    %c0_6 = arith.constant 0 : index
    %c0_7 = arith.constant 0 : index
    %12 = vector.load %arg3[%c0_4, %c0_5, %c0_6, %c0_7] : memref<3x3x16x128xbf16, #tpu.memory_space<vmem>>, vector<1x1x16x128xbf16>
    %13 = vector.shape_cast %12 : vector<1x1x16x128xbf16> to vector<16x128xbf16>
    %cst_8 = arith.constant dense<0.000000e+00> : vector<128x128xf32>
    %14 = tpu.matmul %11, %13, %cst_8 {dimension_numbers = #tpu.dot_dimension_numbers<[1], [0], [0], [1], [0, 0, 1, 1], [], []>} : vector<128x16xbf16>, vector<16x128xbf16>, vector<128x128xf32> -> vector<128x128xf32>
    %15 = arith.addf %5, %14 : vector<128x128xf32>
    %c0_i32_9 = arith.constant 0 : i32
    %16 = arith.addi %4, %c0_i32_9 : i32
    %c0_10 = arith.constant 0 : index
    %17 = arith.index_cast %16 : i32 to index
    %c1 = arith.constant 1 : index
    %c0_11 = arith.constant 0 : index
    %18 = vector.load %arg2[%c0_10, %17, %c1, %c0_11] : memref<1x18x18x16xf32, #tpu.memory_space<vmem>>, vector<1x8x16x16xf32>
    %19 = vector.shape_cast %18 : vector<1x8x16x16xf32> to vector<8x16x16xf32>
    %20 = vector.shape_cast %19 : vector<8x16x16xf32> to vector<128x16xf32>
    %21 = arith.truncf %20 : vector<128x16xf32> to vector<128x16xbf16>
    %c0_12 = arith.constant 0 : index
    %c1_13 = arith.constant 1 : index
    %c0_14 = arith.constant 0 : index
    %c0_15 = arith.constant 0 : index
    %22 = vector.load %arg3[%c0_12, %c1_13, %c0_14, %c0_15] : memref<3x3x16x128xbf16, #tpu.memory_space<vmem>>, vector<1x1x16x128xbf16>
    %23 = vector.shape_cast %22 : vector<1x1x16x128xbf16> to vector<16x128xbf16>
    %cst_16 = arith.constant dense<0.000000e+00> : vector<128x128xf32>
    %24 = tpu.matmul %21, %23, %cst_16 {dimension_numbers = #tpu.dot_dimension_numbers<[1], [0], [0], [1], [0, 0, 1, 1], [], []>} : vector<128x16xbf16>, vector<16x128xbf16>, vector<128x128xf32> -> vector<128x128xf32>
    %25 = arith.addf %15, %24 : vector<128x128xf32>
    %c0_i32_17 = arith.constant 0 : i32
    %26 = arith.addi %4, %c0_i32_17 : i32
    %c0_18 = arith.constant 0 : index
    %27 = arith.index_cast %26 : i32 to index
    %c2 = arith.constant 2 : index
    %c0_19 = arith.constant 0 : index
    %28 = vector.load %arg2[%c0_18, %27, %c2, %c0_19] : memref<1x18x18x16xf32, #tpu.memory_space<vmem>>, vector<1x8x16x16xf32>
    %29 = vector.shape_cast %28 : vector<1x8x16x16xf32> to vector<8x16x16xf32>
    %30 = vector.shape_cast %29 : vector<8x16x16xf32> to vector<128x16xf32>
    %31 = arith.truncf %30 : vector<128x16xf32> to vector<128x16xbf16>
    %c0_20 = arith.constant 0 : index
    %c2_21 = arith.constant 2 : index
    %c0_22 = arith.constant 0 : index
    %c0_23 = arith.constant 0 : index
    %32 = vector.load %arg3[%c0_20, %c2_21, %c0_22, %c0_23] : memref<3x3x16x128xbf16, #tpu.memory_space<vmem>>, vector<1x1x16x128xbf16>
    %33 = vector.shape_cast %32 : vector<1x1x16x128xbf16> to vector<16x128xbf16>
    %cst_24 = arith.constant dense<0.000000e+00> : vector<128x128xf32>
    %34 = tpu.matmul %31, %33, %cst_24 {dimension_numbers = #tpu.dot_dimension_numbers<[1], [0], [0], [1], [0, 0, 1, 1], [], []>} : vector<128x16xbf16>, vector<16x128xbf16>, vector<128x128xf32> -> vector<128x128xf32>
    %35 = arith.addf %25, %34 : vector<128x128xf32>
    %c1_i32 = arith.constant 1 : i32
    %36 = arith.addi %4, %c1_i32 : i32
    %c0_25 = arith.constant 0 : index
    %37 = arith.index_cast %36 : i32 to index
    %c0_26 = arith.constant 0 : index
    %c0_27 = arith.constant 0 : index
    %38 = vector.load %arg2[%c0_25, %37, %c0_26, %c0_27] : memref<1x18x18x16xf32, #tpu.memory_space<vmem>>, vector<1x8x16x16xf32>
    %39 = vector.shape_cast %38 : vector<1x8x16x16xf32> to vector<8x16x16xf32>
    %40 = vector.shape_cast %39 : vector<8x16x16xf32> to vector<128x16xf32>
    %41 = arith.truncf %40 : vector<128x16xf32> to vector<128x16xbf16>
    %c1_28 = arith.constant 1 : index
    %c0_29 = arith.constant 0 : index
    %c0_30 = arith.constant 0 : index
    %c0_31 = arith.constant 0 : index
    %42 = vector.load %arg3[%c1_28, %c0_29, %c0_30, %c0_31] : memref<3x3x16x128xbf16, #tpu.memory_space<vmem>>, vector<1x1x16x128xbf16>
    %43 = vector.shape_cast %42 : vector<1x1x16x128xbf16> to vector<16x128xbf16>
    %cst_32 = arith.constant dense<0.000000e+00> : vector<128x128xf32>
    %44 = tpu.matmul %41, %43, %cst_32 {dimension_numbers = #tpu.dot_dimension_numbers<[1], [0], [0], [1], [0, 0, 1, 1], [], []>} : vector<128x16xbf16>, vector<16x128xbf16>, vector<128x128xf32> -> vector<128x128xf32>
    %45 = arith.addf %35, %44 : vector<128x128xf32>
    %c1_i32_33 = arith.constant 1 : i32
    %46 = arith.addi %4, %c1_i32_33 : i32
    %c0_34 = arith.constant 0 : index
    %47 = arith.index_cast %46 : i32 to index
    %c1_35 = arith.constant 1 : index
    %c0_36 = arith.constant 0 : index
    %48 = vector.load %arg2[%c0_34, %47, %c1_35, %c0_36] : memref<1x18x18x16xf32, #tpu.memory_space<vmem>>, vector<1x8x16x16xf32>
    %49 = vector.shape_cast %48 : vector<1x8x16x16xf32> to vector<8x16x16xf32>
    %50 = vector.shape_cast %49 : vector<8x16x16xf32> to vector<128x16xf32>
    %51 = arith.truncf %50 : vector<128x16xf32> to vector<128x16xbf16>
    %c1_37 = arith.constant 1 : index
    %c1_38 = arith.constant 1 : index
    %c0_39 = arith.constant 0 : index
    %c0_40 = arith.constant 0 : index
    %52 = vector.load %arg3[%c1_37, %c1_38, %c0_39, %c0_40] : memref<3x3x16x128xbf16, #tpu.memory_space<vmem>>, vector<1x1x16x128xbf16>
    %53 = vector.shape_cast %52 : vector<1x1x16x128xbf16> to vector<16x128xbf16>
    %cst_41 = arith.constant dense<0.000000e+00> : vector<128x128xf32>
    %54 = tpu.matmul %51, %53, %cst_41 {dimension_numbers = #tpu.dot_dimension_numbers<[1], [0], [0], [1], [0, 0, 1, 1], [], []>} : vector<128x16xbf16>, vector<16x128xbf16>, vector<128x128xf32> -> vector<128x128xf32>
    %55 = arith.addf %45, %54 : vector<128x128xf32>
    %c1_i32_42 = arith.constant 1 : i32
    %56 = arith.addi %4, %c1_i32_42 : i32
    %c0_43 = arith.constant 0 : index
    %57 = arith.index_cast %56 : i32 to index
    %c2_44 = arith.constant 2 : index
    %c0_45 = arith.constant 0 : index
    %58 = vector.load %arg2[%c0_43, %57, %c2_44, %c0_45] : memref<1x18x18x16xf32, #tpu.memory_space<vmem>>, vector<1x8x16x16xf32>
    %59 = vector.shape_cast %58 : vector<1x8x16x16xf32> to vector<8x16x16xf32>
    %60 = vector.shape_cast %59 : vector<8x16x16xf32> to vector<128x16xf32>
    %61 = arith.truncf %60 : vector<128x16xf32> to vector<128x16xbf16>
    %c1_46 = arith.constant 1 : index
    %c2_47 = arith.constant 2 : index
    %c0_48 = arith.constant 0 : index
    %c0_49 = arith.constant 0 : index
    %62 = vector.load %arg3[%c1_46, %c2_47, %c0_48, %c0_49] : memref<3x3x16x128xbf16, #tpu.memory_space<vmem>>, vector<1x1x16x128xbf16>
    %63 = vector.shape_cast %62 : vector<1x1x16x128xbf16> to vector<16x128xbf16>
    %cst_50 = arith.constant dense<0.000000e+00> : vector<128x128xf32>
    %64 = tpu.matmul %61, %63, %cst_50 {dimension_numbers = #tpu.dot_dimension_numbers<[1], [0], [0], [1], [0, 0, 1, 1], [], []>} : vector<128x16xbf16>, vector<16x128xbf16>, vector<128x128xf32> -> vector<128x128xf32>
    %65 = arith.addf %55, %64 : vector<128x128xf32>
    %c2_i32 = arith.constant 2 : i32
    %66 = arith.addi %4, %c2_i32 : i32
    %c0_51 = arith.constant 0 : index
    %67 = arith.index_cast %66 : i32 to index
    %c0_52 = arith.constant 0 : index
    %c0_53 = arith.constant 0 : index
    %68 = vector.load %arg2[%c0_51, %67, %c0_52, %c0_53] : memref<1x18x18x16xf32, #tpu.memory_space<vmem>>, vector<1x8x16x16xf32>
    %69 = vector.shape_cast %68 : vector<1x8x16x16xf32> to vector<8x16x16xf32>
    %70 = vector.shape_cast %69 : vector<8x16x16xf32> to vector<128x16xf32>
    %71 = arith.truncf %70 : vector<128x16xf32> to vector<128x16xbf16>
    %c2_54 = arith.constant 2 : index
    %c0_55 = arith.constant 0 : index
    %c0_56 = arith.constant 0 : index
    %c0_57 = arith.constant 0 : index
    %72 = vector.load %arg3[%c2_54, %c0_55, %c0_56, %c0_57] : memref<3x3x16x128xbf16, #tpu.memory_space<vmem>>, vector<1x1x16x128xbf16>
    %73 = vector.shape_cast %72 : vector<1x1x16x128xbf16> to vector<16x128xbf16>
    %cst_58 = arith.constant dense<0.000000e+00> : vector<128x128xf32>
    %74 = tpu.matmul %71, %73, %cst_58 {dimension_numbers = #tpu.dot_dimension_numbers<[1], [0], [0], [1], [0, 0, 1, 1], [], []>} : vector<128x16xbf16>, vector<16x128xbf16>, vector<128x128xf32> -> vector<128x128xf32>
    %75 = arith.addf %65, %74 : vector<128x128xf32>
    %c2_i32_59 = arith.constant 2 : i32
    %76 = arith.addi %4, %c2_i32_59 : i32
    %c0_60 = arith.constant 0 : index
    %77 = arith.index_cast %76 : i32 to index
    %c1_61 = arith.constant 1 : index
    %c0_62 = arith.constant 0 : index
    %78 = vector.load %arg2[%c0_60, %77, %c1_61, %c0_62] : memref<1x18x18x16xf32, #tpu.memory_space<vmem>>, vector<1x8x16x16xf32>
    %79 = vector.shape_cast %78 : vector<1x8x16x16xf32> to vector<8x16x16xf32>
    %80 = vector.shape_cast %79 : vector<8x16x16xf32> to vector<128x16xf32>
    %81 = arith.truncf %80 : vector<128x16xf32> to vector<128x16xbf16>
    %c2_63 = arith.constant 2 : index
    %c1_64 = arith.constant 1 : index
    %c0_65 = arith.constant 0 : index
    %c0_66 = arith.constant 0 : index
    %82 = vector.load %arg3[%c2_63, %c1_64, %c0_65, %c0_66] : memref<3x3x16x128xbf16, #tpu.memory_space<vmem>>, vector<1x1x16x128xbf16>
    %83 = vector.shape_cast %82 : vector<1x1x16x128xbf16> to vector<16x128xbf16>
    %cst_67 = arith.constant dense<0.000000e+00> : vector<128x128xf32>
    %84 = tpu.matmul %81, %83, %cst_67 {dimension_numbers = #tpu.dot_dimension_numbers<[1], [0], [0], [1], [0, 0, 1, 1], [], []>} : vector<128x16xbf16>, vector<16x128xbf16>, vector<128x128xf32> -> vector<128x128xf32>
    %85 = arith.addf %75, %84 : vector<128x128xf32>
    %c2_i32_68 = arith.constant 2 : i32
    %86 = arith.addi %4, %c2_i32_68 : i32
    %c0_69 = arith.constant 0 : index
    %87 = arith.index_cast %86 : i32 to index
    %c2_70 = arith.constant 2 : index
    %c0_71 = arith.constant 0 : index
    %88 = vector.load %arg2[%c0_69, %87, %c2_70, %c0_71] : memref<1x18x18x16xf32, #tpu.memory_space<vmem>>, vector<1x8x16x16xf32>
    %89 = vector.shape_cast %88 : vector<1x8x16x16xf32> to vector<8x16x16xf32>
    %90 = vector.shape_cast %89 : vector<8x16x16xf32> to vector<128x16xf32>
    %91 = arith.truncf %90 : vector<128x16xf32> to vector<128x16xbf16>
    %c2_72 = arith.constant 2 : index
    %c2_73 = arith.constant 2 : index
    %c0_74 = arith.constant 0 : index
    %c0_75 = arith.constant 0 : index
    %92 = vector.load %arg3[%c2_72, %c2_73, %c0_74, %c0_75] : memref<3x3x16x128xbf16, #tpu.memory_space<vmem>>, vector<1x1x16x128xbf16>
    %93 = vector.shape_cast %92 : vector<1x1x16x128xbf16> to vector<16x128xbf16>
    %cst_76 = arith.constant dense<0.000000e+00> : vector<128x128xf32>
    %94 = tpu.matmul %91, %93, %cst_76 {dimension_numbers = #tpu.dot_dimension_numbers<[1], [0], [0], [1], [0, 0, 1, 1], [], []>} : vector<128x16xbf16>, vector<16x128xbf16>, vector<128x128xf32> -> vector<128x128xf32>
    %95 = arith.addf %85, %94 : vector<128x128xf32>
    %c0_77 = arith.constant 0 : index
    %c0_78 = arith.constant 0 : index
    %96 = vector.load %arg4[%c0_77, %c0_78] : memref<1x128xf32, #tpu.memory_space<vmem>>, vector<1x128xf32>
    %97 = vector.broadcast %96 : vector<1x128xf32> to vector<128x128xf32>
    %98 = arith.addf %95, %97 : vector<128x128xf32>
    %c0_79 = arith.constant 0 : index
    %c0_80 = arith.constant 0 : index
    %c0_81 = arith.constant 0 : index
    %99 = vector.load %arg5[%c0_79, %c0_80, %c0_81] : memref<1x128x128xf32, #tpu.memory_space<vmem>>, vector<1x128x128xf32>
    %100 = vector.shape_cast %99 : vector<1x128x128xf32> to vector<128x128xf32>
    %101 = vector.shape_cast %98 : vector<128x128xf32> to vector<1x128x128xf32>
    tpu.vector_store %arg5[%c0_79, %c0_80, %c0_81], %101 {strides = array<i32>} : memref<1x128x128xf32, #tpu.memory_space<vmem>>, vector<1x128x128xf32>,
    %cst_82 = arith.constant dense<0.000000e+00> : vector<128xf32>
    %102 = vector.multi_reduction <add>, %98, %cst_82 [0] : vector<128x128xf32> to vector<128xf32>
    %103 = vector.shape_cast %102 : vector<128xf32> to vector<1x128xf32>
    %104 = arith.mulf %98, %98 : vector<128x128xf32>
    %cst_83 = arith.constant dense<0.000000e+00> : vector<128xf32>
    %105 = vector.multi_reduction <add>, %104, %cst_83 [0] : vector<128x128xf32> to vector<128xf32>
    %106 = vector.shape_cast %105 : vector<128xf32> to vector<1x128xf32>
    %c0_84 = arith.constant 0 : index
    %c0_85 = arith.constant 0 : index
    %c0_86 = arith.constant 0 : index
    %107 = vector.load %arg6[%c0_84, %c0_85, %c0_86] : memref<1x2x128xf32, #tpu.memory_space<vmem>>, vector<1x2x128xf32>
    %108 = vector.shape_cast %107 : vector<1x2x128xf32> to vector<2x128xf32>
    %109 = tpu.concatenate %103, %106 in 0 : vector<1x128xf32>, vector<1x128xf32> -> vector<2x128xf32>
    %110 = arith.addf %108, %109 : vector<2x128xf32>
    %c0_87 = arith.constant 0 : index
    %c0_88 = arith.constant 0 : index
    %c0_89 = arith.constant 0 : index
    %111 = vector.load %arg6[%c0_87, %c0_88, %c0_89] : memref<1x2x128xf32, #tpu.memory_space<vmem>>, vector<1x2x128xf32>
    %112 = vector.shape_cast %111 : vector<1x2x128xf32> to vector<2x128xf32>
    %113 = vector.shape_cast %110 : vector<2x128xf32> to vector<1x2x128xf32>
    tpu.vector_store %arg6[%c0_87, %c0_88, %c0_89], %113 {strides = array<i32>} : memref<1x2x128xf32, #tpu.memory_space<vmem>>, vector<1x2x128xf32>,
    return
  }
  func.func @transform_0(%arg0: i32, %arg1: i32) -> (i32, i32, i32, i32) {
    %c0_i32 = arith.constant 0 : i32
    %c0_i32_0 = arith.constant 0 : i32
    %c0_i32_1 = arith.constant 0 : i32
    %c0_i32_2 = arith.constant 0 : i32
    return %arg0, %c0_i32, %c0_i32_0, %c0_i32_1 : i32, i32, i32, i32
  }
  func.func @transform_1(%arg0: i32, %arg1: i32) -> (i32, i32, i32, i32) {
    %c0_i32 = arith.constant 0 : i32
    %c0_i32_0 = arith.constant 0 : i32
    %c0_i32_1 = arith.constant 0 : i32
    %c0_i32_2 = arith.constant 0 : i32
    %c0_i32_3 = arith.constant 0 : i32
    return %c0_i32, %c0_i32_0, %c0_i32_1, %c0_i32_2 : i32, i32, i32, i32
  }
  func.func @transform_2(%arg0: i32, %arg1: i32) -> (i32, i32) {
    %c0_i32 = arith.constant 0 : i32
    %c0_i32_0 = arith.constant 0 : i32
    %c0_i32_1 = arith.constant 0 : i32
    return %c0_i32, %c0_i32_0 : i32, i32
  }
  func.func @transform_3(%arg0: i32, %arg1: i32) -> (i32, i32, i32) {
    %c0_i32 = arith.constant 0 : i32
    %c0_i32_0 = arith.constant 0 : i32
    return %arg0, %arg1, %c0_i32 : i32, i32, i32
  }
  func.func @transform_4(%arg0: i32, %arg1: i32) -> (i32, i32, i32) {
    %c0_i32 = arith.constant 0 : i32
    %c0_i32_0 = arith.constant 0 : i32
    %c0_i32_1 = arith.constant 0 : i32
    return %arg0, %c0_i32, %c0_i32_0 : i32, i32, i32
  }
}

module attributes {stable_mosaic.version = 11 : i64} {
  func.func @_bn_act_kernel(%arg0: i32, %arg1: i32, %arg2: memref<1x256x128xf32, #tpu.memory_space<vmem>>, %arg3: memref<1x128xf32, #tpu.memory_space<vmem>>, %arg4: memref<1x128xf32, #tpu.memory_space<vmem>>, %arg5: memref<1x256x128xf32, #tpu.memory_space<vmem>>) attributes {dimension_semantics = [#tpu.dimension_semantics<parallel>, #tpu.dimension_semantics<parallel>], iteration_bounds = array<i64: 2, 1>, scalar_prefetch = 0 : i64, scratch_operands = 0 : i64, tpu.core_type = #tpu.core_type<tc>, window_params = [{transform_indices = @transform_0, window_bounds = array<i64: 1, 256, 128>}, {pipeline_mode = #tpu.pipeline_mode<synchronous>, transform_indices = @transform_1, window_bounds = array<i64: 1, 128>}, {pipeline_mode = #tpu.pipeline_mode<synchronous>, transform_indices = @transform_2, window_bounds = array<i64: 1, 128>}, {transform_indices = @transform_3, window_bounds = array<i64: 1, 256, 128>}]} {
    %c0 = arith.constant 0 : index
    %c0_0 = arith.constant 0 : index
    %c0_1 = arith.constant 0 : index
    %0 = vector.load %arg2[%c0, %c0_0, %c0_1] : memref<1x256x128xf32, #tpu.memory_space<vmem>>, vector<1x256x128xf32>
    %c0_2 = arith.constant 0 : index
    %c0_3 = arith.constant 0 : index
    %1 = vector.load %arg3[%c0_2, %c0_3] : memref<1x128xf32, #tpu.memory_space<vmem>>, vector<1x128xf32>
    %2 = vector.shape_cast %1 : vector<1x128xf32> to vector<1x1x128xf32>
    %3 = vector.broadcast %2 : vector<1x1x128xf32> to vector<1x256x128xf32>
    %4 = arith.mulf %0, %3 : vector<1x256x128xf32>
    %c0_4 = arith.constant 0 : index
    %c0_5 = arith.constant 0 : index
    %5 = vector.load %arg4[%c0_4, %c0_5] : memref<1x128xf32, #tpu.memory_space<vmem>>, vector<1x128xf32>
    %6 = vector.shape_cast %5 : vector<1x128xf32> to vector<1x1x128xf32>
    %7 = vector.broadcast %6 : vector<1x1x128xf32> to vector<1x256x128xf32>
    %8 = arith.addf %4, %7 : vector<1x256x128xf32>
    %cst = arith.constant 0.000000e+00 : f32
    %9 = vector.broadcast %cst : f32 to vector<1x256x128xf32>
    %10 = arith.maximumf %8, %9 : vector<1x256x128xf32>
    %c0_6 = arith.constant 0 : index
    %c0_7 = arith.constant 0 : index
    %c0_8 = arith.constant 0 : index
    %11 = vector.load %arg5[%c0_6, %c0_7, %c0_8] : memref<1x256x128xf32, #tpu.memory_space<vmem>>, vector<1x256x128xf32>
    tpu.vector_store %arg5[%c0_6, %c0_7, %c0_8], %10 {strides = array<i32>} : memref<1x256x128xf32, #tpu.memory_space<vmem>>, vector<1x256x128xf32>,
    return
  }
  func.func @transform_0(%arg0: i32, %arg1: i32) -> (i32, i32, i32) {
    %c0_i32 = arith.constant 0 : i32
    %c0_i32_0 = arith.constant 0 : i32
    return %arg0, %arg1, %c0_i32 : i32, i32, i32
  }
  func.func @transform_1(%arg0: i32, %arg1: i32) -> (i32, i32) {
    %c0_i32 = arith.constant 0 : i32
    %c0_i32_0 = arith.constant 0 : i32
    %c0_i32_1 = arith.constant 0 : i32
    return %c0_i32, %c0_i32_0 : i32, i32
  }
  func.func @transform_2(%arg0: i32, %arg1: i32) -> (i32, i32) {
    %c0_i32 = arith.constant 0 : i32
    %c0_i32_0 = arith.constant 0 : i32
    %c0_i32_1 = arith.constant 0 : i32
    return %c0_i32, %c0_i32_0 : i32, i32
  }
  func.func @transform_3(%arg0: i32, %arg1: i32) -> (i32, i32, i32) {
    %c0_i32 = arith.constant 0 : i32
    %c0_i32_0 = arith.constant 0 : i32
    return %arg0, %arg1, %c0_i32 : i32, i32, i32
  }
}

</mosaic_0001>

<bundles_post_ra>
// kernel: conv_block_forward.3
= control target key start
LH: loop header
LB: loop body
LE: loop exit
PB: predicated region body
PF: predicated region fallthrough
CT: control target
= control target key end

     0   :  { %s548_s12 = smov 0   ;;  %s550_s13 = smov 0   ;;  %s757_s0 = inlined_call_operand.vmem [shape: f32[2,256,128], index: 0, kind: input, shape index: {}, may-alias: {0,3}]   ;;  %s758_s1 = inlined_call_operand.vmem [shape: f32[1,128], index: 1, kind: input, shape index: {}]   ;;  %s759_s2 = inlined_call_operand.vmem [shape: f32[1,128], index: 2, kind: input, shape index: {}]   ;;  %s760_s3 = inlined_call_operand.vmem [shape: f32[2,256,128], index: 3, kind: output, shape index: {}, may-alias: {0,3}]  }
   0x1   :  { %s552_s14 = smov 0  }
   0x2 LB: > { %s25_s15 = sadd.s32 1, %s522_s13  ;;  %p469_p0 = scmp.ge.s32.totalorder %s526_s14, 1  ;;  %s526_s14 = sphi %s552_s14, %s13_s14   ;;  %s522_s13 = sphi %s550_s13, %s762_s13   ;;  %s518_s12 = sphi %s548_s12, %s761_s12  }
   0x3   : > { %p27_p1 = scmp.ge.s32.totalorder %s25_s15, 2  ;;  %p158_p2 = scmp.lt.s32.totalorder %s526_s14, 3 }
   0x5   : > { %s764_s15 = smov (%p27_p1, %s25_s15), 0  ;;  %p159_p3 = pnand %p469_p0, %p158_p2 }
   0x6   : > { %p191_p4 = scmp.lt.s32.totalorder (!%p159_p3), %s518_s12, 1 }
   0x7   : > { %162 = sbr.rel (%p159_p3) target bundleno = 58 (0x3a), region = 32 }
   0xc   : > { %s766_s12 = smov (!%p191_p4, %s518_s12), 1  ;;  %v571_v0 = vld [vmem:[%s758_s1] ss:$0 sm:$0xff] }
   0xd   : > { %s476_s18 = sshll.u32 %s766_s12, 8  ;;  %v584_v1 = vld [vmem:[%s759_s2] ss:$0 sm:$0xff] }
   0xe   : > { %s579_s21 = scalar_lea.vmem %s757_s0, %s476_s18  ;;  %s619_s26 = scalar_lea.vmem %s760_s3, %s476_s18 }
   0xf   : > { %v210_v2 = vld [vmem:[%s579_s21] sm:$0xff]  ;;  %v211_v3 = vld [vmem:[%s579_s21 + $0x8] sm:$0xff]  ;;  %v212_v4 = vld [vmem:[%s579_s21 + $0x10] sm:$0xff] }
  0x10   : > { %v213_v5 = vld [vmem:[%s579_s21 + $0x18] sm:$0xff]  ;;  %v214_v6 = vld [vmem:[%s579_s21 + $0x20] sm:$0xff]  ;;  %v215_v7 = vld [vmem:[%s579_s21 + $0x28] sm:$0xff]  ;;  %v246_v8 = vmul.f32 %v571_v0, %v210_v2  ;;  %v247_v9 = vmul.f32 %v571_v0, %v211_v3  ;;  %v248_v10 = vmul.f32 %v571_v0, %v212_v4 }
  0x11   : > { %v216_v11 = vld [vmem:[%s579_s21 + $0x30] sm:$0xff]  ;;  %v249_v12 = vmul.f32 %v571_v0, %v213_v5  ;;  %v217_v13 = vld [vmem:[%s579_s21 + $0x38] sm:$0xff]  ;;  %v250_v15 = vmul.f32 %v571_v0, %v214_v6  ;;  %v218_v16 = vld [vmem:[%s579_s21 + $0x40] sm:$0xff]  ;;  %v251_v18 = vmul.f32 %v571_v0, %v215_v7 }
  0x12   : > { %v282_v14 = vadd.f32 %v584_v1, %v246_v8  ;;  %v283_v17 = vadd.f32 %v584_v1, %v247_v9  ;;  %v219_v19 = vld [vmem:[%s579_s21 + $0x48] sm:$0xff]  ;;  %v284_v20 = vadd.f32 %v584_v1, %v248_v10  ;;  %v252_v21 = vmul.f32 %v571_v0, %v216_v11  ;;  %v220_v22 = vld [vmem:[%s579_s21 + $0x50] sm:$0xff]  ;;  %v221_v25 = vld [vmem:[%s579_s21 + $0x58] sm:$0xff] }
  0x13   : > { %v285_v23 = vadd.f32 %v584_v1, %v249_v12  ;;  %v253_v24 = vmul.f32 %v571_v0, %v217_v13  ;;  %v222_v26 = vld [vmem:[%s579_s21 + $0x60] sm:$0xff]  ;;  %v223_v27 = vld [vmem:[%s579_s21 + $0x68] sm:$0xff]  ;;  %v286_v29 = vadd.f32 %v584_v1, %v250_v15  ;;  %v254_v30 = vmul.f32 %v571_v0, %v218_v16  ;;  %v224_v31 = vld [vmem:[%s579_s21 + $0x70] sm:$0xff] }
  0x14   : > { %v314_v28 = vmax.f32 %v282_v14, 0.0  ;;  %v225_v32 = vld [vmem:[%s579_s21 + $0x78] sm:$0xff]  ;;  %v226_v33 = vld [vmem:[%s579_s21 + $0x80] sm:$0xff]  ;;  %v227_v34 = vld [vmem:[%s579_s21 + $0x88] sm:$0xff]  ;;  %v315_v43 = vmax.f32 %v283_v17, 0.0  ;;  %v287_v44 = vadd.f32 %v584_v1, %v251_v18  ;;  %v255_v45 = vmul.f32 %v571_v0, %v219_v19 }
  0x15   : > { %v228_v35 = vld [vmem:[%s579_s21 + $0x90] sm:$0xff]  ;;  %v229_v36 = vld [vmem:[%s579_s21 + $0x98] sm:$0xff]  ;;  %v230_v37 = vld [vmem:[%s579_s21 + $0xa0] sm:$0xff]  ;;  %v316_v49 = vmax.f32 %v284_v20, 0.0  ;;  %v288_v50 = vadd.f32 %v584_v1, %v252_v21  ;;  %v256_v51 = vmul.f32 %v571_v0, %v220_v22  ;;  %v317_v55 = vmax.f32 %v285_v23, 0.0 }
  0x16   : > { %v231_v38 = vld [vmem:[%s579_s21 + $0xa8] sm:$0xff]  ;;  %v232_v39 = vld [vmem:[%s579_s21 + $0xb0] sm:$0xff]  ;;  %v631_v40 = vld [vmem:[%s579_s21 + $0xb8] sm:$0xff]  ;;  %v289_v56 = vadd.f32 %v584_v1, %v253_v24  ;;  %v257_v57 = vmul.f32 %v571_v0, %v221_v25  ;;  %v318_v58 = vmax.f32 %v286_v29, 0.0  ;;  %v290_v59 = vadd.f32 %v584_v1, %v254_v30 }
  0x17   : > { %v634_v41 = vld [vmem:[%s579_s21 + $0xc0] sm:$0xff]  ;;  %v637_v42 = vld [vmem:[%s579_s21 + $0xc8] sm:$0xff]  ;;  %v642_v46 = vld [vmem:[%s579_s21 + $0xd0] sm:$0xff]  ;;  %v258_v60 = vmul.f32 %v571_v0, %v222_v26  ;;  %v319_v61 = vmax.f32 %v287_v44, 0.0  ;;  %v291_v62 = vadd.f32 %v584_v1, %v255_v45  ;;  %v259_v63 = vmul.f32 %v571_v0, %v223_v27 }
  0x18   : > { %v645_v47 = vld [vmem:[%s579_s21 + $0xd8] sm:$0xff]  ;;  %v648_v48 = vld [vmem:[%s579_s21 + $0xe0] sm:$0xff]  ;;  %v653_v52 = vld [vmem:[%s579_s21 + $0xe8] sm:$0xff]  ;;  %v320_v2 = vmax.f32 %v288_v50, 0.0  ;;  %v292_v3 = vadd.f32 %v584_v1, %v256_v51  ;;  %v260_v4 = vmul.f32 %v571_v0, %v224_v31  ;;  %v321_v5 = vmax.f32 %v289_v56, 0.0 }
  0x19   : > { %v656_v53 = vld [vmem:[%s579_s21 + $0xf0] sm:$0xff]  ;;  %v659_v54 = vld [vmem:[%s579_s21 + $0xf8] sm:$0xff]  ;;  %v293_v6 = vadd.f32 %v584_v1, %v257_v57  ;;  %v261_v7 = vmul.f32 %v571_v0, %v225_v32  ;;  %v322_v8 = vmax.f32 %v290_v59, 0.0  ;;  %v294_v9 = vadd.f32 %v584_v1, %v258_v60 }
  0x1a   : > { %346 = vst [vmem:[%s619_s26] sm:$0xff] %v314_v28  ;;  %v262_v10 = vmul.f32 %v571_v0, %v226_v33  ;;  %v323_v11 = vmax.f32 %v291_v62, 0.0  ;;  %v295_v12 = vadd.f32 %v584_v1, %v259_v63  ;;  %v263_v13 = vmul.f32 %v571_v0, %v227_v34 }
  0x1b   : > { %347 = vst [vmem:[%s619_s26 + $0x8] sm:$0xff] %v315_v43  ;;  %v324_v14 = vmax.f32 %v292_v3, 0.0  ;;  %v296_v15 = vadd.f32 %v584_v1, %v260_v4  ;;  %v264_v16 = vmul.f32 %v571_v0, %v228_v35  ;;  %v325_v17 = vmax.f32 %v293_v6, 0.0 }
  0x1c   : > { %348 = vst [vmem:[%s619_s26 + $0x10] sm:$0xff] %v316_v49  ;;  %v297_v18 = vadd.f32 %v584_v1, %v261_v7  ;;  %v265_v19 = vmul.f32 %v571_v0, %v229_v36  ;;  %v326_v20 = vmax.f32 %v294_v9, 0.0  ;;  %v298_v21 = vadd.f32 %v584_v1, %v262_v10 }
  0x1d   : > { %349 = vst [vmem:[%s619_s26 + $0x18] sm:$0xff] %v317_v55  ;;  %v266_v22 = vmul.f32 %v571_v0, %v230_v37  ;;  %v327_v23 = vmax.f32 %v295_v12, 0.0  ;;  %v299_v24 = vadd.f32 %v584_v1, %v263_v13  ;;  %v267_v25 = vmul.f32 %v571_v0, %v231_v38 }
  0x1e   : > { %350 = vst [vmem:[%s619_s26 + $0x20] sm:$0xff] %v318_v58  ;;  %v328_v26 = vmax.f32 %v296_v15, 0.0  ;;  %v300_v27 = vadd.f32 %v584_v1, %v264_v16  ;;  %v268_v28 = vmul.f32 %v571_v0, %v232_v39  ;;  %v329_v29 = vmax.f32 %v297_v18, 0.0 }
  0x1f   : > { %351 = vst [vmem:[%s619_s26 + $0x28] sm:$0xff] %v319_v61  ;;  %v301_v30 = vadd.f32 %v584_v1, %v265_v19  ;;  %v269_v31 = vmul.f32 %v571_v0, %v631_v40  ;;  %v330_v32 = vmax.f32 %v298_v21, 0.0  ;;  %v302_v33 = vadd.f32 %v584_v1, %v266_v22 }
  0x20   : > { %352 = vst [vmem:[%s619_s26 + $0x30] sm:$0xff] %v320_v2  ;;  %v270_v34 = vmul.f32 %v571_v0, %v634_v41  ;;  %v331_v35 = vmax.f32 %v299_v24, 0.0  ;;  %v303_v36 = vadd.f32 %v584_v1, %v267_v25  ;;  %v271_v37 = vmul.f32 %v571_v0, %v637_v42 }
  0x21   : > { %353 = vst [vmem:[%s619_s26 + $0x38] sm:$0xff] %v321_v5  ;;  %v332_v38 = vmax.f32 %v300_v27, 0.0  ;;  %v304_v39 = vadd.f32 %v584_v1, %v268_v28  ;;  %v272_v40 = vmul.f32 %v571_v0, %v642_v46  ;;  %v333_v43 = vmax.f32 %v301_v30, 0.0 }
  0x22   : > { %354 = vst [vmem:[%s619_s26 + $0x40] sm:$0xff] %v322_v8  ;;  %v305_v41 = vadd.f32 %v584_v1, %v269_v31  ;;  %v273_v44 = vmul.f32 %v571_v0, %v645_v47  ;;  %v334_v45 = vmax.f32 %v302_v33, 0.0  ;;  %v306_v42 = vadd.f32 %v584_v1, %v270_v34 }
  0x23   : > { %355 = vst [vmem:[%s619_s26 + $0x48] sm:$0xff] %v323_v11  ;;  %v274_v49 = vmul.f32 %v571_v0, %v648_v48  ;;  %v335_v50 = vmax.f32 %v303_v36, 0.0  ;;  %v307_v46 = vadd.f32 %v584_v1, %v271_v37  ;;  %v275_v51 = vmul.f32 %v571_v0, %v653_v52 }
  0x24   : > { %356 = vst [vmem:[%s619_s26 + $0x50] sm:$0xff] %v324_v14  ;;  %v336_v55 = vmax.f32 %v304_v39, 0.0  ;;  %v308_v47 = vadd.f32 %v584_v1, %v272_v40  ;;  %v276_v56 = vmul.f32 %v571_v0, %v656_v53  ;;  %v337_v48 = vmax.f32 %v305_v41, 0.0 }
  0x25   : > { %357 = vst [vmem:[%s619_s26 + $0x58] sm:$0xff] %v325_v17  ;;  %v309_v57 = vadd.f32 %v584_v1, %v273_v44  ;;  %v277_v58 = vmul.f32 %v571_v0, %v659_v54  ;;  %v338_v52 = vmax.f32 %v306_v42, 0.0  ;;  %v310_v59 = vadd.f32 %v584_v1, %v274_v49 }
  0x26   : > { %358 = vst [vmem:[%s619_s26 + $0x60] sm:$0xff] %v326_v20  ;;  %v339_v60 = vmax.f32 %v307_v46, 0.0  ;;  %v311_v53 = vadd.f32 %v584_v1, %v275_v51  ;;  %v340_v61 = vmax.f32 %v308_v47, 0.0  ;;  %v312_v62 = vadd.f32 %v584_v1, %v276_v56 }
  0x27   : > { %359 = vst [vmem:[%s619_s26 + $0x68] sm:$0xff] %v327_v23  ;;  %v341_v0 = vmax.f32 %v309_v57, 0.0  ;;  %v313_v54 = vadd.f32 %v584_v1, %v277_v58  ;;  %v342_v63 = vmax.f32 %v310_v59, 0.0 }
  0x28   : > { %360 = vst [vmem:[%s619_s26 + $0x70] sm:$0xff] %v328_v26  ;;  %v343_v2 = vmax.f32 %v311_v53, 0.0  ;;  %v344_v3 = vmax.f32 %v312_v62, 0.0 }
  0x29   : > { %361 = vst [vmem:[%s619_s26 + $0x78] sm:$0xff] %v329_v29  ;;  %v345_v4 = vmax.f32 %v313_v54, 0.0 }
  0x2a   : > { %362 = vst [vmem:[%s619_s26 + $0x80] sm:$0xff] %v330_v32 }
  0x2b   : > { %363 = vst [vmem:[%s619_s26 + $0x88] sm:$0xff] %v331_v35 }
  0x2c   : > { %364 = vst [vmem:[%s619_s26 + $0x90] sm:$0xff] %v332_v38 }
  0x2d   : > { %365 = vst [vmem:[%s619_s26 + $0x98] sm:$0xff] %v333_v43 }
  0x2e   : > { %366 = vst [vmem:[%s619_s26 + $0xa0] sm:$0xff] %v334_v45 }
  0x2f   : > { %367 = vst [vmem:[%s619_s26 + $0xa8] sm:$0xff] %v335_v50 }
  0x30   : > { %368 = vst [vmem:[%s619_s26 + $0xb0] sm:$0xff] %v336_v55 }
  0x31   : > { %369 = vst [vmem:[%s619_s26 + $0xb8] sm:$0xff] %v337_v48 }
  0x32   : > { %370 = vst [vmem:[%s619_s26 + $0xc0] sm:$0xff] %v338_v52 }
  0x33   : > { %371 = vst [vmem:[%s619_s26 + $0xc8] sm:$0xff] %v339_v60 }
  0x34   : > { %372 = vst [vmem:[%s619_s26 + $0xd0] sm:$0xff] %v340_v61 }
  0x35   : > { %373 = vst [vmem:[%s619_s26 + $0xd8] sm:$0xff] %v341_v0 }
  0x36   : > { %374 = vst [vmem:[%s619_s26 + $0xe0] sm:$0xff] %v342_v63 }
  0x37   : > { %375 = vst [vmem:[%s619_s26 + $0xe8] sm:$0xff] %v343_v2 }
  0x38   : > { %376 = vst [vmem:[%s619_s26 + $0xf0] sm:$0xff] %v344_v3 }
  0x39   : > { %377 = vst [vmem:[%s619_s26 + $0xf8] sm:$0xff] %v345_v4 }
  0x3a PF: > { %s13_s14 = sadd.s32 1, %s526_s14   ;;  %s761_s12 = smov %s522_s13 }
  0x3b   : > { %p10_p5 = scmp.ge.s32.totalorder %s13_s14, 4   ;;  %s762_s13 = smov %s764_s15 }
  0x3d   :  { %12 = sbr.rel (!%p10_p5) target bundleno = 2 (0x2), region = 62 }

// kernel: conv_block_forward.2
= control target key start
LH: loop header
LB: loop body
LE: loop exit
PB: predicated region body
PF: predicated region fallthrough
CT: control target
= control target key end

     0   :  { %s1897_s15 = smov 0   ;;  %s1899_s16 = smov 0   ;;  %s2347_s0 = inlined_call_operand.vmem [shape: f32[2,18,18,16], index: 0, kind: input, shape index: {}]   ;;  %s2348_s1 = inlined_call_operand.vmem [shape: bf16[3,3,16,128], index: 1, kind: input, shape index: {}]   ;;  %s2349_s2 = inlined_call_operand.vmem [shape: f32[1,128], index: 2, kind: input, shape index: {}]   ;;  %s2350_s3 = inlined_call_operand.vmem [shape: f32[2,256,128], index: 3, kind: output, shape index: {0}]   ;;  %s2351_s4 = inlined_call_operand.vmem [shape: f32[2,2,128], index: 4, kind: output, shape index: {1}]  }
   0x1   :  { %s1901_s17 = smov 0   ;;  %s1903_s18 = smov 0  }
   0x2   :  { %s1905_s19 = smov 0  }
   0x3 LB: > { %s24_s20 = sadd.s32 1, %s1861_s17  ;;  %s27_s21 = sadd.s32 1, %s1865_s18  ;;  %s1869_s19 = sphi %s1905_s19, %s15_s19   ;;  %s1865_s18 = sphi %s1903_s18, %s2355_s18   ;;  %s1861_s17 = sphi %s1901_s17, %s2354_s17   ;;  %s1857_s16 = sphi %s1899_s16, %s2353_s16   ;;  %s1853_s15 = sphi %s1897_s15, %s2352_s15  }
   0x4   : > { %p25_p0 = scmp.ge.s32.totalorder %s24_s20, 2  ;;  %p1541_p1 = scmp.ge.s32.totalorder %s1869_s19, 1 }
   0x5   : > { %p179_p2 = scmp.lt.s32.totalorder %s1869_s19, 5 }
   0x6   : > { %s2357_s20 = smov (%p25_p0, %s24_s20), 0  ;;  %s2359_s21 = smov (!%p25_p0, %s27_s21), %s1865_s18 }
   0x7   : > { %p180_p3 = pnand %p1541_p1, %p179_p2  ;;  %p29_p4 = scmp.ge.s32.totalorder %s2359_s21, 2 }
   0x8   : > { %p213_p5 = scmp.lt.s32.totalorder (!%p180_p3), %s1857_s16, 1  ;;  %s1543_s22 = sshll.u32 (!%p180_p3), %s1853_s15, 4 }
   0x9   : > { %s2361_s21 = smov (%p29_p4, %s2359_s21), 0  ;;  %183 = sbr.rel (%p180_p3) target bundleno = 473 (0x1d9), region = 32 }
   0xa   : > { %p221_p6 = scmp.lt.s32.totalorder (!%p180_p3), %s1543_s22, 31  ;;  %p1547_p7 = scmp.ne.s32.totalorder (!%p180_p3), %s1853_s15, 0 }
   0xe   : > { %s2363_s16 = smov (!%p213_p5, %s1857_s16), 1  ;;  %s2365_s22 = smov (!%p221_p6, %s1543_s22), 31 }
   0xf   : > { %s1788_s23 = smul.u32 432, %s2363_s16  ;;  %s1544_s24 = sshll.u32 %s2363_s16, 5 }
  0x10   : > { %s224_s25 = sadd.s32 %s1544_s24, %s2365_s22  ;;  %s1546_s26 = sshll.u32 %s2363_s16, 1 }
  0x11   : > { %s217_s29 = scalar_lea.vmem %s2347_s0, %s1788_s23  ;;  %s1545_s30 = sshll.u32 %s224_s25, 3 }
  0x12   : > { %s1936_s7 = scalar_lea.vmem %s2350_s3, %s1545_s30  ;;  %s1941_s10 = scalar_lea.vmem %s2351_s4, %s1546_s26 }
  0x13   : > { %236 = sbr.rel (%p1547_p7) target bundleno = 26 (0x1a), region = 36 }
  0x18   : > { %v1871_v0 = vmov 0.0  }
  0x19   : > { %237 = vst [vmem:[%s1941_s10] sm:$0x3] %v1871_v0 }
  0x1a PF: > { %v1777_v1 = vld [vmem:[%s2348_s1 + $0x8] sm:$0xff]  ;;  %s1549_s13 = smul.u32 192, %s1853_s15  ;;  %v1778_v2 = vld [vmem:[%s2348_s1 + $0x10] sm:$0xff]  ;;  %v1779_v3 = vld [vmem:[%s2348_s1 + $0x18] sm:$0xff]  ;;  %vm300_vm0 = vcmask 130048   ;;  %vm1408_vm1 = vcmask 1040384  }
  0x1b   : > { %v1776_v4 = vld [vmem:[%s2348_s1] sm:$0xff]  ;;  %1785 = vmatpush.bf16.msra.mxu1 %v1777_v1  ;;  %1786 = vmatpush.bf16.msra.mxu2 %v1777_v1  ;;  %v1782_v18 = vld [vmem:[%s2348_s1 + $0x30] sm:$0xff]  ;;  %v1783_v19 = vld [vmem:[%s2348_s1 + $0x38] sm:$0xff] }
  0x1c   : > { %v1780_v5 = vld [vmem:[%s2348_s1 + $0x20] sm:$0xff]  ;;  %s1961_s28 = scalar_lea.vmem %s217_s29, %s1549_s13  ;;  %1787 = vmatpush.bf16.msra.mxu3 %v1777_v1  ;;  %332 = vmatpush.bf16.msra.mxu0 %v1777_v1  ;;  %v1781_v20 = vld [vmem:[%s2348_s1 + $0x28] sm:$0xff] }
  0x1d   : > { %v271_v6 = vld [vmem:[%s1961_s28 + $0x31] sm:$0xff]  ;;  %v272_v7 = vld [vmem:[%s1961_s28 + $0x39] sm:$0xff]  ;;  %v275_v8 = vld [vmem:[%s1961_s28 + $0x61] sm:$0xff] }
  0x1e   : > { %v1966_v9 = vpack.c.bf16 %v272_v7, %v271_v6  ;;  %v276_v10 = vld [vmem:[%s1961_s28 + $0x69] sm:$0xff]  ;;  %v279_v11 = vld [vmem:[%s1961_s28 + $0x91] sm:$0xff]  ;;  %v280_v12 = vld [vmem:[%s1961_s28 + $0x99] sm:$0xff] }
  0x1f   : > { %517 = vmatpush.bf16.msrb.mxu2 %v1778_v2  ;;  %v1971_v13 = vpack.c.bf16 %v276_v10, %v275_v8  ;;  %v1973_v14 = vpack.c.bf16 %v280_v12, %v279_v11  ;;  %v267_v15 = vld [vmem:[%s1961_s28 + $0x1] sm:$0xff]  ;;  %v268_v16 = vld [vmem:[%s1961_s28 + $0x9] sm:$0xff]  ;;  %411 = vmatpush.bf16.msrb.mxu1 %v1776_v4  ;;  %v274_v23 = vld [vmem:[%s1961_s28 + $0x51] sm:$0xff] }
  0x20   : > { %642 = vmatpush.bf16.msrb.mxu3 %v1779_v3  ;;  %764 = vmatpush.bf16.msrb.mxu0 %v1780_v5  ;;  %v283_v17 = vpack.c.bf16 %v268_v16, %v267_v15  ;;  %v1784_v21 = vld [vmem:[%s2348_s1 + $0x40] sm:$0xff]  ;;  %v273_v22 = vld [vmem:[%s1961_s28 + $0x49] sm:$0xff]  ;;  %v282_v27 = vld [vmem:[%s1961_s28 + $0xb1] sm:$0xff] }
  0x21   : > { %1558 = vmatmul.msk.bf16.vlgmr.msra.gmra.mxu1 %vm300_vm0, %v1966_v9  ;;  %1560 = vmatmul.msk.bf16.vlgmr.msra.gmra.mxu2 %vm300_vm0, %v1971_v13  ;;  %v277_v24 = vld [vmem:[%s1961_s28 + $0x79] sm:$0xff]  ;;  %v278_v25 = vld [vmem:[%s1961_s28 + $0x81] sm:$0xff]  ;;  %v281_v26 = vld [vmem:[%s1961_s28 + $0xa9] sm:$0xff]  ;;  %v2004_v30 = vpack.c.bf16 %v274_v23, %v273_v22 }
  0x22   : > { %1562 = vmatmul.msk.bf16.vlgmr.msra.gmra.mxu3 %vm300_vm0, %v1973_v14  ;;  %1556 = vmatmul.msk.bf16.vlgmr.msra.gmra.mxu0 %vm300_vm0, %v283_v17  ;;  %v269_v28 = vld [vmem:[%s1961_s28 + $0x19] sm:$0xff]  ;;  %v270_v29 = vld [vmem:[%s1961_s28 + $0x21] sm:$0xff]  ;;  %v2006_v31 = vpack.c.bf16 %v278_v25, %v277_v24  ;;  %v2008_v32 = vpack.c.bf16 %v282_v27, %v281_v26  ;;  %v454_v37 = vld [vmem:[%s1961_s28 + $0xa] sm:$0xff] }
  0x23   : > { %1011 = vmatpush.bf16.msra.mxu2 %v1782_v18  ;;  %886 = vmatpush.bf16.msra.mxu1 %v1781_v20  ;;  %v284_v33 = vpack.c.bf16 %v270_v29, %v269_v28  ;;  %v241_v34 = vld [vmem:[%s1961_s28] sm:$0xff]  ;;  %v242_v35 = vld [vmem:[%s1961_s28 + $0x8] sm:$0xff]  ;;  %v1592_v38 = vld [vmem:[%s1961_s28 + $0x18] sm:$0xff] }
  0x24   : > { %1133 = vmatpush.bf16.msra.mxu3 %v1783_v19  ;;  %1255 = vmatpush.bf16.msra.mxu0 %v1784_v21  ;;  %v453_v36 = vld [vmem:[%s1961_s28 + $0x2] sm:$0xff]  ;;  %v257_v40 = vpack.c.bf16 %v242_v35, %v241_v34  ;;  %v455_v43 = vld [vmem:[%s1961_s28 + $0x1a] sm:$0xff]  ;;  %v1594_v45 = vld [vmem:[%s1961_s28 + $0x30] sm:$0xff] }
  0x25   : > { %v1593_v39 = vld [vmem:[%s1961_s28 + $0x20] sm:$0xff]  ;;  %v469_v41 = vpack.c.bf16 %v454_v37, %v453_v36  ;;  %v1595_v46 = vld [vmem:[%s1961_s28 + $0x38] sm:$0xff]  ;;  %v1596_v51 = vld [vmem:[%s1961_s28 + $0x48] sm:$0xff] }
  0x26   : > { %v594_v42 = vpack.c.bf16 %v1593_v39, %v1592_v38  ;;  %v456_v44 = vld [vmem:[%s1961_s28 + $0x22] sm:$0xff]  ;;  %v2033_v48 = vpack.c.bf16 %v1595_v46, %v1594_v45  ;;  %v457_v49 = vld [vmem:[%s1961_s28 + $0x32] sm:$0xff]  ;;  %v458_v50 = vld [vmem:[%s1961_s28 + $0x3a] sm:$0xff] }
  0x27   : > { %v2031_v47 = vpack.c.bf16 %v456_v44, %v455_v43  ;;  %v1597_v52 = vld [vmem:[%s1961_s28 + $0x50] sm:$0xff]  ;;  %v2046_v53 = vpack.c.bf16 %v458_v50, %v457_v49  ;;  %v1598_v57 = vld [vmem:[%s1961_s28 + $0x60] sm:$0xff]  ;;  %v1599_v58 = vld [vmem:[%s1961_s28 + $0x68] sm:$0xff] }
  0x28   : > { %v2048_v54 = vpack.c.bf16 %v1597_v52, %v1596_v51  ;;  %v459_v55 = vld [vmem:[%s1961_s28 + $0x4a] sm:$0xff]  ;;  %v460_v56 = vld [vmem:[%s1961_s28 + $0x52] sm:$0xff]  ;;  %v2064_v60 = vpack.c.bf16 %v1599_v58, %v1598_v57  ;;  %v461_v61 = vld [vmem:[%s1961_s28 + $0x62] sm:$0xff] }
  0x29   : > { %v2062_v59 = vpack.c.bf16 %v460_v56, %v459_v55  ;;  %v462_v62 = vld [vmem:[%s1961_s28 + $0x6a] sm:$0xff]  ;;  %v1600_v63 = vld [vmem:[%s1961_s28 + $0x78] sm:$0xff]  ;;  %v1601_v0 = vld [vmem:[%s1961_s28 + $0x80] sm:$0xff] }
  0x2a   : > { %v2078_v1 = vpack.c.bf16 %v462_v62, %v461_v61  ;;  %v2080_v2 = vpack.c.bf16 %v1601_v0, %v1600_v63  ;;  %v463_v3 = vld [vmem:[%s1961_s28 + $0x7a] sm:$0xff]  ;;  %v464_v4 = vld [vmem:[%s1961_s28 + $0x82] sm:$0xff]  ;;  %v1602_v5 = vld [vmem:[%s1961_s28 + $0x90] sm:$0xff] }
  0x2b   : > { %v1603_v6 = vld [vmem:[%s1961_s28 + $0x98] sm:$0xff]  ;;  %v2094_v7 = vpack.c.bf16 %v464_v4, %v463_v3  ;;  %v1604_v12 = vld [vmem:[%s1961_s28 + $0xa8] sm:$0xff]  ;;  %v1605_v15 = vld [vmem:[%s1961_s28 + $0xb0] sm:$0xff] }
  0x2c   : > { %v2096_v8 = vpack.c.bf16 %v1603_v6, %v1602_v5  ;;  %v465_v10 = vld [vmem:[%s1961_s28 + $0x92] sm:$0xff]  ;;  %v466_v11 = vld [vmem:[%s1961_s28 + $0x9a] sm:$0xff]  ;;  %v2114_v18 = vpack.c.bf16 %v1605_v15, %v1604_v12  ;;  %v467_v24 = vld [vmem:[%s1961_s28 + $0xaa] sm:$0xff] }
  0x2d   : > { %v2112_v17 = vpack.c.bf16 %v466_v11, %v465_v10  ;;  %v468_v25 = vld [vmem:[%s1961_s28 + $0xb2] sm:$0xff]  ;;  %v1606_v26 = vld [vmem:[%s1961_s28 + $0xc0] sm:$0xff]  ;;  %v1607_v27 = vld [vmem:[%s1961_s28 + $0xc8] sm:$0xff] }
  0x2e   : > { %v1636_v28 = vld [vmem:[%s1961_s28 + $0xc1] sm:$0xff]  ;;  %v1637_v29 = vld [vmem:[%s1961_s28 + $0xc9] sm:$0xff]  ;;  %v2142_v36 = vpack.c.bf16 %v468_v25, %v467_v24  ;;  %v2144_v37 = vpack.c.bf16 %v1607_v27, %v1606_v26 }
  0x2f   : > { %v2146_v38 = vpack.c.bf16 %v1637_v29, %v1636_v28 }
  0x31   : > { %1559 = vmatmul.msk.bf16.gmra.mxu1 %vm300_vm0, %v2004_v30  ;;  %1561 = vmatmul.msk.bf16.gmra.mxu2 %vm300_vm0, %v2006_v31 }
  0x32   : > { %1563 = vmatmul.msk.bf16.gmra.mxu3 %vm300_vm0, %v2008_v32  ;;  %1557 = vmatmul.msk.bf16.gmra.mxu0 %vm300_vm0, %v284_v33 }
  0x41   : > { %1568 = vmatmul.msk.bf16.vlgmr.msrb.gmra.mxu1 %vm300_vm0, %v257_v40  ;;  %1582 = vmatmul.msk.bf16.vlgmr.msrb.gmra.mxu2 %vm300_vm0, %v469_v41 }
  0x42   : > { %1614 = vmatmul.msk.bf16.vlgmr.msrb.gmra.mxu3 %vm300_vm0, %v594_v42  ;;  %1644 = vmatmul.msk.bf16.vlgmr.msrb.gmra.mxu0 %vm300_vm0, %v284_v33 }
  0x51   : > { %1569 = vmatmul.msk.bf16.gmra.mxu1 %vm300_vm0, %v594_v42  ;;  %1583 = vmatmul.msk.bf16.gmra.mxu2 %vm300_vm0, %v2031_v47 }
  0x52   : > { %1615 = vmatmul.msk.bf16.gmra.mxu3 %vm300_vm0, %v2033_v48  ;;  %1645 = vmatmul.msk.bf16.gmra.mxu0 %vm300_vm0, %v1966_v9 }
  0x61   : > { %1570 = vmatmul.msk.bf16.gmra.mxu1 %vm300_vm0, %v2033_v48  ;;  %1584 = vmatmul.msk.bf16.gmra.mxu2 %vm300_vm0, %v2046_v53 }
  0x62   : > { %1616 = vmatmul.msk.bf16.gmra.mxu3 %vm300_vm0, %v2048_v54  ;;  %1646 = vmatmul.msk.bf16.gmra.mxu0 %vm300_vm0, %v2004_v30 }
  0x71   : > { %1571 = vmatmul.msk.bf16.gmra.mxu1 %vm300_vm0, %v2048_v54  ;;  %1585 = vmatmul.msk.bf16.gmra.mxu2 %vm300_vm0, %v2062_v59 }
  0x72   : > { %1617 = vmatmul.msk.bf16.gmra.mxu3 %vm300_vm0, %v2064_v60  ;;  %1647 = vmatmul.msk.bf16.gmra.mxu0 %vm300_vm0, %v1971_v13 }
  0x81   : > { %1572 = vmatmul.msk.bf16.gmra.mxu1 %vm300_vm0, %v2064_v60  ;;  %1586 = vmatmul.msk.bf16.gmra.mxu2 %vm300_vm0, %v2078_v1 }
  0x82   : > { %1618 = vmatmul.msk.bf16.gmra.mxu3 %vm300_vm0, %v2080_v2  ;;  %1648 = vmatmul.msk.bf16.gmra.mxu0 %vm300_vm0, %v2006_v31 }
  0x91   : > { %1573 = vmatmul.msk.bf16.gmra.mxu1 %vm300_vm0, %v2080_v2  ;;  %1587 = vmatmul.msk.bf16.gmra.mxu2 %vm300_vm0, %v2094_v7 }
  0x92   : > { %1619 = vmatmul.msk.bf16.gmra.mxu3 %vm300_vm0, %v2096_v8  ;;  %1649 = vmatmul.msk.bf16.gmra.mxu0 %vm300_vm0, %v1973_v14 }
  0x9e   : > { %v2110_v16 = vpop.f32.mrf.mxu1 }
  0x9f   : > { %v334_v19 = vpop.f32.mrf.mxu0 }
  0xa1   : > { %1574 = vmatmul.msk.bf16.gmra.mxu1 %vm300_vm0, %v2096_v8  ;;  %1588 = vmatmul.msk.bf16.gmra.mxu2 %vm300_vm0, %v2112_v17 }
  0xa2   : > { %1620 = vmatmul.msk.bf16.gmra.mxu3 %vm300_vm0, %v2114_v18  ;;  %1650 = vmatmul.msk.bf16.gmra.mxu0 %vm300_vm0, %v2008_v32 }
  0xa4   : > { %v2124_v20 = vpop.f32.mrf.mxu2 }
  0xa5   : > { %v2126_v21 = vpop.f32.mrf.mxu3 }
  0xa6   : > { %v2128_v22 = vpop.f32.mrf.mxu1 }
  0xa7   : > { %v336_v23 = vpop.f32.mrf.mxu0 }
  0xac   : > { %v2136_v33 = vpop.f32.mrf.mxu2 }
  0xad   : > { %v2138_v34 = vpop.f32.mrf.mxu3 }
  0xae   : > { %v2140_v35 = vpop.f32.mrf.mxu1 }
  0xaf   : > { %v339_v39 = vpop.f32.mrf.mxu0 }
  0xb1   : > { %1575 = vmatmul.msk.bf16.gmra.mxu1 %vm300_vm0, %v2114_v18  ;;  %1589 = vmatmul.msk.bf16.gmra.mxu2 %vm300_vm0, %v2142_v36 }
  0xb2   : > { %1621 = vmatmul.msk.bf16.gmra.mxu3 %vm300_vm0, %v2144_v37  ;;  %1651 = vmatmul.msk.bf16.gmra.mxu0 %vm300_vm0, %v2146_v38 }
  0xb4   : > { %v2156_v40 = vpop.f32.mrf.mxu2 }
  0xb5   : > { %v2158_v41 = vpop.f32.mrf.mxu3 }
  0xb6   : > { %v2160_v42 = vpop.f32.mrf.mxu1 }
  0xb7   : > { %v341_v43 = vpop.f32.mrf.mxu0 }
  0xbc   : > { %v2162_v44 = vpop.f32.mrf.mxu2 }
  0xbd   : > { %v2164_v45 = vpop.f32.mrf.mxu3 }
  0xbe   : > { %v413_v46 = vpop.f32.mrf.mxu1 }
  0xbf   : > { %v414_v49 = vadd.f32 %v413_v46, %v334_v19  ;;  %v766_v50 = vpop.f32.mrf.mxu0 }
  0xc1   : > { %1674 = vmatmul.msk.bf16.vlgmr.msra.gmra.mxu1 %vm300_vm0, %v2031_v47  ;;  %1706 = vmatmul.msk.bf16.vlgmr.msra.gmra.mxu2 %vm300_vm0, %v2033_v48 }
  0xc2   : > { %1736 = vmatmul.msk.bf16.vlgmr.msra.gmra.mxu3 %vm300_vm0, %v1966_v9  ;;  %1766 = vmatmul.msk.bf16.vlgmr.msra.gmra.mxu0 %vm300_vm0, %v2046_v53 }
  0xc4   : > { %v519_v51 = vpop.f32.mrf.mxu2 }
  0xc5   : > { %v644_v52 = vpop.f32.mrf.mxu3  ;;  %v559_v55 = vadd.f32 %v519_v51, %v414_v49 }
  0xc6   : > { %v415_v56 = vpop.f32.mrf.mxu1 }
  0xc7   : > { %v416_v57 = vadd.f32 %v415_v56, %v336_v23  ;;  %v684_v58 = vadd.f32 %v644_v52, %v559_v55  ;;  %v768_v61 = vpop.f32.mrf.mxu0 }
  0xc9   : > { %v2174_v62 = vadd.f32 %v766_v50, %v684_v58 }
  0xcc   : > { %v521_v63 = vpop.f32.mrf.mxu2 }
  0xcd   : > { %v646_v47 = vpop.f32.mrf.mxu3  ;;  %v560_v0 = vadd.f32 %v521_v63, %v416_v57 }
  0xce   : > { %v418_v3 = vpop.f32.mrf.mxu1 }
  0xcf   : > { %v419_v48 = vadd.f32 %v418_v3, %v339_v39  ;;  %v685_v4 = vadd.f32 %v646_v47, %v560_v0  ;;  %v771_v5 = vpop.f32.mrf.mxu0 }
  0xd1   : > { %1675 = vmatmul.msk.bf16.gmra.mxu1 %vm300_vm0, %v2046_v53  ;;  %1707 = vmatmul.msk.bf16.gmra.mxu2 %vm300_vm0, %v2048_v54  ;;  %v2182_v9 = vadd.f32 %v768_v61, %v685_v4 }
  0xd2   : > { %1737 = vmatmul.msk.bf16.gmra.mxu3 %vm300_vm0, %v2004_v30  ;;  %1767 = vmatmul.msk.bf16.gmra.mxu0 %vm300_vm0, %v2062_v59 }
  0xd4   : > { %v524_v6 = vpop.f32.mrf.mxu2 }
  0xd5   : > { %v649_v10 = vpop.f32.mrf.mxu3  ;;  %v561_v11 = vadd.f32 %v524_v6, %v419_v48 }
  0xd6   : > { %v420_v12 = vpop.f32.mrf.mxu1 }
  0xd7   : > { %v421_v15 = vadd.f32 %v420_v12, %v341_v43  ;;  %v686_v19 = vadd.f32 %v649_v10, %v561_v11  ;;  %v773_v23 = vpop.f32.mrf.mxu0 }
  0xd9   : > { %v2186_v24 = vadd.f32 %v771_v5, %v686_v19 }
  0xdc   : > { %v526_v53 = vpop.f32.mrf.mxu2 }
  0xdd   : > { %v651_v25 = vpop.f32.mrf.mxu3  ;;  %v562_v54 = vadd.f32 %v526_v53, %v421_v15 }
  0xde   : > { %v423_v26 = vpop.f32.mrf.mxu1 }
  0xdf   : > { %v424_v30 = vadd.f32 %v423_v26, %v2110_v16  ;;  %v687_v27 = vadd.f32 %v651_v25, %v562_v54  ;;  %v776_v28 = vpop.f32.mrf.mxu0 }
  0xe1   : > { %1676 = vmatmul.msk.bf16.gmra.mxu1 %vm300_vm0, %v2062_v59  ;;  %1708 = vmatmul.msk.bf16.gmra.mxu2 %vm300_vm0, %v2064_v60  ;;  %v2195_v29 = vadd.f32 %v773_v23, %v687_v27 }
  0xe2   : > { %1738 = vmatmul.msk.bf16.gmra.mxu3 %vm300_vm0, %v1971_v13  ;;  %1768 = vmatmul.msk.bf16.gmra.mxu0 %vm300_vm0, %v2078_v1 }
  0xe4   : > { %v529_v39 = vpop.f32.mrf.mxu2 }
  0xe5   : > { %v654_v43 = vpop.f32.mrf.mxu3  ;;  %v563_v46 = vadd.f32 %v529_v39, %v424_v30 }
  0xe6   : > { %v425_v16 = vpop.f32.mrf.mxu1 }
  0xe7   : > { %v426_v49 = vadd.f32 %v425_v16, %v2128_v22  ;;  %v688_v50 = vadd.f32 %v654_v43, %v563_v46  ;;  %v778_v51 = vpop.f32.mrf.mxu0 }
  0xe9   : > { %v2200_v59 = vadd.f32 %v776_v28, %v688_v50 }
  0xec   : > { %v531_v52 = vpop.f32.mrf.mxu2 }
  0xed   : > { %v656_v60 = vpop.f32.mrf.mxu3  ;;  %v564_v55 = vadd.f32 %v531_v52, %v426_v49  ;;  %v1757_v52 = vld [vmem:[%s1961_s28 + $0xca] sm:$0xff] }
  0xee   : > { %v428_v56 = vpop.f32.mrf.mxu1 }
  0xef   : > { %v429_v13 = vadd.f32 %v428_v56, %v2140_v35  ;;  %v689_v57 = vadd.f32 %v656_v60, %v564_v55  ;;  %v781_v58 = vpop.f32.mrf.mxu0 }
  0xf1   : > { %1677 = vmatmul.msk.bf16.gmra.mxu1 %vm300_vm0, %v2078_v1  ;;  %1709 = vmatmul.msk.bf16.gmra.mxu2 %vm300_vm0, %v2080_v2  ;;  %v2209_v22 = vadd.f32 %v778_v51, %v689_v57  ;;  %v1756_v51 = vld [vmem:[%s1961_s28 + $0xc2] sm:$0xff] }
  0xf2   : > { %1739 = vmatmul.msk.bf16.gmra.mxu3 %vm300_vm0, %v2006_v31  ;;  %1769 = vmatmul.msk.bf16.gmra.mxu0 %vm300_vm0, %v2094_v7 }
  0xf4   : > { %v534_v61 = vpop.f32.mrf.mxu2 }
  0xf5   : > { %v659_v63 = vpop.f32.mrf.mxu3  ;;  %v565_v47 = vadd.f32 %v534_v61, %v429_v13  ;;  %v1213_v13 = vpack.c.bf16 %v1757_v52, %v1756_v51 }
  0xf6   : > { %v430_v35 = vpop.f32.mrf.mxu1 }
  0xf7   : > { %v431_v0 = vadd.f32 %v430_v35, %v2160_v42  ;;  %v690_v3 = vadd.f32 %v659_v63, %v565_v47  ;;  %v783_v48 = vpop.f32.mrf.mxu0 }
  0xf9   : > { %v2214_v1 = vadd.f32 %v781_v58, %v690_v3  ;;  %v1698_v3 = vld [vmem:[%s1961_s28 + $0xd8] sm:$0xff] }
  0xfc   : > { %v536_v4 = vpop.f32.mrf.mxu2 }
  0xfd   : > { %v661_v2 = vpop.f32.mrf.mxu3  ;;  %v566_v5 = vadd.f32 %v536_v4, %v431_v0  ;;  %v1728_v4 = vld [vmem:[%s1961_s28 + $0xd9] sm:$0xff] }
  0xfe   : > { %v433_v6 = vpop.f32.mrf.mxu1 }
  0xff   : > { %v691_v31 = vadd.f32 %v661_v2, %v566_v5  ;;  %v786_v10 = vpop.f32.mrf.mxu0  ;;  %v434_v11 = vadd.f32 %v433_v6, %v2124_v20  ;;  %v1758_v5 = vld [vmem:[%s1961_s28 + $0xda] sm:$0xff]  ;;  %v1759_v6 = vld [vmem:[%s1961_s28 + $0xe2] sm:$0xff] }
 0x101   : > { %1678 = vmatmul.msk.bf16.gmra.mxu1 %vm300_vm0, %v2094_v7  ;;  %1710 = vmatmul.msk.bf16.gmra.mxu2 %vm300_vm0, %v2096_v8  ;;  %v2222_v42 = vadd.f32 %v783_v48, %v691_v31 }
 0x102   : > { %1740 = vmatmul.msk.bf16.gmra.mxu3 %vm300_vm0, %v1973_v14  ;;  %1770 = vmatmul.msk.bf16.gmra.mxu0 %vm300_vm0, %v2112_v17 }
 0x104   : > { %v539_v12 = vpop.f32.mrf.mxu2 }
 0x105   : > { %v664_v15 = vpop.f32.mrf.mxu3  ;;  %v567_v19 = vadd.f32 %v539_v12, %v434_v11 }
 0x106   : > { %v435_v23 = vpop.f32.mrf.mxu1 }
 0x107   : > { %v692_v53 = vadd.f32 %v664_v15, %v567_v19  ;;  %v788_v25 = vpop.f32.mrf.mxu0  ;;  %v436_v8 = vadd.f32 %v435_v23, %v2136_v33  ;;  %v1214_v19 = vpack.c.bf16 %v1759_v6, %v1758_v5 }
 0x109   : > { %v2227_v7 = vadd.f32 %v786_v10, %v692_v53 }
 0x10c   : > { %v541_v54 = vpop.f32.mrf.mxu2 }
 0x10d   : > { %v666_v26 = vpop.f32.mrf.mxu3  ;;  %v568_v14 = vadd.f32 %v541_v54, %v436_v8 }
 0x10e   : > { %v438_v30 = vpop.f32.mrf.mxu1 }
 0x10f   : > { %v693_v27 = vadd.f32 %v666_v26, %v568_v14  ;;  %v791_v28 = vpop.f32.mrf.mxu0  ;;  %v439_v33 = vadd.f32 %v438_v30, %v2156_v40 }
 0x111   : > { %1679 = vmatmul.msk.bf16.gmra.mxu1 %vm300_vm0, %v2112_v17  ;;  %1711 = vmatmul.msk.bf16.gmra.mxu2 %vm300_vm0, %v2114_v18  ;;  %v2236_v20 = vadd.f32 %v788_v25, %v693_v27 }
 0x112   : > { %1741 = vmatmul.msk.bf16.gmra.mxu3 %vm300_vm0, %v2008_v32  ;;  %1771 = vmatmul.msk.bf16.gmra.mxu0 %vm300_vm0, %v2142_v36 }
 0x114   : > { %v544_v39 = vpop.f32.mrf.mxu2 }
 0x115   : > { %v669_v43 = vpop.f32.mrf.mxu3  ;;  %v569_v46 = vadd.f32 %v544_v39, %v439_v33 }
 0x116   : > { %v440_v16 = vpop.f32.mrf.mxu1 }
 0x117   : > { %v694_v49 = vadd.f32 %v669_v43, %v569_v46  ;;  %v793_v50 = vpop.f32.mrf.mxu0  ;;  %v441_v18 = vadd.f32 %v440_v16, %v2162_v44 }
 0x119   : > { %v2241_v17 = vadd.f32 %v791_v28, %v694_v49 }
 0x11c   : > { %v546_v32 = vpop.f32.mrf.mxu2 }
 0x11d   : > { %v671_v60 = vpop.f32.mrf.mxu3  ;;  %v570_v55 = vadd.f32 %v546_v32, %v441_v18 }
 0x11e   : > { %v443_v56 = vpop.f32.mrf.mxu1 }
 0x11f   : > { %v695_v57 = vadd.f32 %v671_v60, %v570_v55  ;;  %v796_v40 = vpop.f32.mrf.mxu0  ;;  %v444_v58 = vadd.f32 %v443_v56, %v2126_v21 }
 0x121   : > { %1680 = vmatmul.msk.bf16.gmra.mxu1 %vm300_vm0, %v2142_v36  ;;  %1712 = vmatmul.msk.bf16.gmra.mxu2 %vm300_vm0, %v2144_v37  ;;  %v2252_v44 = vadd.f32 %v793_v50, %v695_v57  ;;  %v1699_v37 = vld [vmem:[%s1961_s28 + $0xe0] sm:$0xff] }
 0x122   : > { %1742 = vmatmul.msk.bf16.gmra.mxu3 %vm300_vm0, %v2146_v38  ;;  %1772 = vmatmul.msk.bf16.gmra.mxu0 %vm300_vm0, %v1213_v13  ;;  %v1729_v38 = vld [vmem:[%s1961_s28 + $0xe1] sm:$0xff]  ;;  %v970_v12 = vpack.c.bf16 %v1699_v37, %v1698_v3 }
 0x123   : > { %v1092_v15 = vpack.c.bf16 %v1729_v38, %v1728_v4 }
 0x124   : > { %v549_v61 = vpop.f32.mrf.mxu2 }
 0x125   : > { %v674_v63 = vpop.f32.mrf.mxu3  ;;  %v571_v47 = vadd.f32 %v549_v61, %v444_v58 }
 0x126   : > { %v445_v35 = vpop.f32.mrf.mxu1 }
 0x127   : > { %v696_v36 = vadd.f32 %v674_v63, %v571_v47  ;;  %v798_v0 = vpop.f32.mrf.mxu0  ;;  %v446_v2 = vadd.f32 %v445_v35, %v2138_v34 }
 0x129   : > { %v2257_v48 = vadd.f32 %v796_v40, %v696_v36 }
 0x12c   : > { %v551_v31 = vpop.f32.mrf.mxu2 }
 0x12d   : > { %v676_v10 = vpop.f32.mrf.mxu3  ;;  %v572_v11 = vadd.f32 %v551_v31, %v446_v2 }
 0x12e   : > { %v448_v21 = vpop.f32.mrf.mxu1 }
 0x12f   : > { %v697_v23 = vadd.f32 %v676_v10, %v572_v11  ;;  %v801_v53 = vpop.f32.mrf.mxu0  ;;  %v449_v34 = vadd.f32 %v448_v21, %v2158_v41 }
 0x131   : > { %1681 = vmatmul.msk.bf16.gmra.mxu1 %vm300_vm0, %v1213_v13  ;;  %1713 = vmatmul.msk.bf16.gmra.mxu2 %vm300_vm0, %v970_v12  ;;  %v2268_v25 = vadd.f32 %v798_v0, %v697_v23 }
 0x132   : > { %1743 = vmatmul.msk.bf16.gmra.mxu3 %vm300_vm0, %v1092_v15  ;;  %1773 = vmatmul.msk.bf16.gmra.mxu0 %vm300_vm0, %v1214_v19 }
 0x134   : > { %v554_v8 = vpop.f32.mrf.mxu2 }
 0x135   : > { %v679_v54 = vpop.f32.mrf.mxu3  ;;  %v573_v26 = vadd.f32 %v554_v8, %v449_v34 }
 0x136   : > { %v450_v14 = vpop.f32.mrf.mxu1 }
 0x137   : > { %v698_v30 = vadd.f32 %v679_v54, %v573_v26  ;;  %v803_v27 = vpop.f32.mrf.mxu0  ;;  %v451_v33 = vadd.f32 %v450_v14, %v2164_v45  ;;  %v2281_v45 = vld [vmem:[%s2349_s2] ss:$0 sm:$0xff] }
 0x139   : > { %v2272_v28 = vadd.f32 %v801_v53, %v698_v30 }
 0x13c   : > { %v556_v39 = vpop.f32.mrf.mxu2 }
 0x13d   : > { %v681_v43 = vpop.f32.mrf.mxu3  ;;  %v574_v46 = vadd.f32 %v556_v39, %v451_v33 }
 0x13e   : > { %v888_v16 = vpop.f32.mrf.mxu1 }
 0x13f   : > { %v699_v49 = vadd.f32 %v681_v43, %v574_v46  ;;  %v1257_v50 = vpop.f32.mrf.mxu0  ;;  %v928_v41 = vadd.f32 %v888_v16, %v2174_v62 }
 0x141   : > { %v2275_v18 = vadd.f32 %v803_v27, %v699_v49 }
 0x144   : > { %v1013_v51 = vpop.f32.mrf.mxu2 }
 0x145   : > { %v1135_v52 = vpop.f32.mrf.mxu3  ;;  %v1053_v32 = vadd.f32 %v1013_v51, %v928_v41 }
 0x146   : > { %v890_v60 = vpop.f32.mrf.mxu1 }
 0x147   : > { %v1175_v55 = vadd.f32 %v1135_v52, %v1053_v32  ;;  %v1259_v56 = vpop.f32.mrf.mxu0  ;;  %v929_v40 = vadd.f32 %v890_v60, %v2182_v9 }
 0x149   : > { %v1297_v13 = vadd.f32 %v1257_v50, %v1175_v55 }
 0x14b   : > { %v1317_v57 = vadd.f32 %v2281_v45, %v1297_v13 }
 0x14c   : > { %v1015_v58 = vpop.f32.mrf.mxu2 }
 0x14d   : > { %v1137_v61 = vpop.f32.mrf.mxu3  ;;  %1333 = vst [vmem:[%s1936_s7] sm:$0xff] %v1317_v57  ;;  %v1054_v62 = vadd.f32 %v1015_v58, %v929_v40  ;;  %v1370_v38 = vmul.f32 %v1317_v57, %v1317_v57 }
 0x14e   : > { %v893_v63 = vpop.f32.mrf.mxu1 }
 0x14f   : > { %v1176_v47 = vadd.f32 %v1137_v61, %v1054_v62  ;;  %v1262_v35 = vpop.f32.mrf.mxu0  ;;  %v930_v3 = vadd.f32 %v893_v63, %v2186_v24 }
 0x151   : > { %v1298_v36 = vadd.f32 %v1259_v56, %v1176_v47 }
 0x153   : > { %v1318_v0 = vadd.f32 %v2281_v45, %v1298_v36 }
 0x154   : > { %v1018_v37 = vpop.f32.mrf.mxu2 }
 0x155   : > { %v1140_v4 = vpop.f32.mrf.mxu3  ;;  %1334 = vst [vmem:[%s1936_s7 + $0x8] sm:$0xff] %v1318_v0  ;;  %v1349_v2 = vadd.f32 %v1318_v0, %v1317_v57  ;;  %v1371_v5 = vmul.f32 %v1318_v0, %v1318_v0  ;;  %v1055_v9 = vadd.f32 %v1018_v37, %v930_v3 }
 0x156   : > { %v895_v6 = vpop.f32.mrf.mxu1 }
 0x157   : > { %v1386_v31 = vadd.f32 %v1371_v5, %v1370_v38  ;;  %v1177_v10 = vadd.f32 %v1140_v4, %v1055_v9  ;;  %v1264_v11 = vpop.f32.mrf.mxu0  ;;  %v931_v15 = vadd.f32 %v895_v6, %v2195_v29 }
 0x159   : > { %v1299_v21 = vadd.f32 %v1262_v35, %v1177_v10 }
 0x15b   : > { %v1319_v12 = vadd.f32 %v2281_v45, %v1299_v21 }
 0x15c   : > { %v1020_v19 = vpop.f32.mrf.mxu2 }
 0x15d   : > { %v1142_v24 = vpop.f32.mrf.mxu3  ;;  %1335 = vst [vmem:[%s1936_s7 + $0x10] sm:$0xff] %v1319_v12  ;;  %v1350_v23 = vadd.f32 %v1349_v2, %v1319_v12  ;;  %v1372_v53 = vmul.f32 %v1319_v12, %v1319_v12  ;;  %v1056_v34 = vadd.f32 %v1020_v19, %v931_v15 }
 0x15e   : > { %v898_v8 = vpop.f32.mrf.mxu1 }
 0x15f   : > { %v1387_v54 = vadd.f32 %v1386_v31, %v1372_v53  ;;  %v1178_v26 = vadd.f32 %v1142_v24, %v1056_v34  ;;  %v1267_v14 = vpop.f32.mrf.mxu0  ;;  %v932_v33 = vadd.f32 %v898_v8, %v2200_v59 }
 0x161   : > { %v1300_v30 = vadd.f32 %v1264_v11, %v1178_v26 }
 0x163   : > { %v1320_v27 = vadd.f32 %v2281_v45, %v1300_v30 }
 0x164   : > { %v1023_v39 = vpop.f32.mrf.mxu2 }
 0x165   : > { %v1145_v43 = vpop.f32.mrf.mxu3  ;;  %1336 = vst [vmem:[%s1936_s7 + $0x18] sm:$0xff] %v1320_v27  ;;  %v1351_v29 = vadd.f32 %v1350_v23, %v1320_v27  ;;  %v1373_v46 = vmul.f32 %v1320_v27, %v1320_v27  ;;  %v1057_v16 = vadd.f32 %v1023_v39, %v932_v33 }
 0x166   : > { %v900_v49 = vpop.f32.mrf.mxu1 }
 0x167   : > { %v1388_v50 = vadd.f32 %v1387_v54, %v1373_v46  ;;  %v1179_v41 = vadd.f32 %v1145_v43, %v1057_v16  ;;  %v1269_v51 = vpop.f32.mrf.mxu0  ;;  %v933_v60 = vadd.f32 %v900_v49, %v2209_v22 }
 0x169   : > { %v1301_v52 = vadd.f32 %v1267_v14, %v1179_v41 }
 0x16b   : > { %v1321_v32 = vadd.f32 %v2281_v45, %v1301_v52 }
 0x16c   : > { %v1025_v55 = vpop.f32.mrf.mxu2 }
 0x16d   : > { %v1147_v56 = vpop.f32.mrf.mxu3  ;;  %1337 = vst [vmem:[%s1936_s7 + $0x20] sm:$0xff] %v1321_v32  ;;  %v1352_v59 = vadd.f32 %v1351_v29, %v1321_v32  ;;  %v1374_v13 = vmul.f32 %v1321_v32, %v1321_v32  ;;  %v1058_v57 = vadd.f32 %v1025_v55, %v933_v60 }
 0x16e   : > { %v903_v40 = vpop.f32.mrf.mxu1 }
 0x16f   : > { %v1389_v58 = vadd.f32 %v1388_v50, %v1374_v13  ;;  %v1180_v61 = vadd.f32 %v1147_v56, %v1058_v57  ;;  %v1272_v62 = vpop.f32.mrf.mxu0  ;;  %v934_v35 = vadd.f32 %v903_v40, %v2214_v1 }
 0x171   : > { %v1302_v63 = vadd.f32 %v1269_v51, %v1180_v61 }
 0x173   : > { %v1322_v47 = vadd.f32 %v2281_v45, %v1302_v63 }
 0x174   : > { %v1028_v36 = vpop.f32.mrf.mxu2 }
 0x175   : > { %v1150_v0 = vpop.f32.mrf.mxu3  ;;  %1338 = vst [vmem:[%s1936_s7 + $0x28] sm:$0xff] %v1322_v47  ;;  %v1353_v22 = vadd.f32 %v1352_v59, %v1322_v47  ;;  %v1375_v3 = vmul.f32 %v1322_v47, %v1322_v47  ;;  %v1059_v37 = vadd.f32 %v1028_v36, %v934_v35 }
 0x176   : > { %v905_v4 = vpop.f32.mrf.mxu1 }
 0x177   : > { %v1390_v38 = vadd.f32 %v1389_v58, %v1375_v3  ;;  %v1181_v2 = vadd.f32 %v1150_v0, %v1059_v37  ;;  %v1274_v5 = vpop.f32.mrf.mxu0  ;;  %v935_v31 = vadd.f32 %v905_v4, %v2222_v42 }
 0x179   : > { %v1303_v9 = vadd.f32 %v1272_v62, %v1181_v2 }
 0x17b   : > { %v1323_v6 = vadd.f32 %v2281_v45, %v1303_v9 }
 0x17c   : > { %v1030_v10 = vpop.f32.mrf.mxu2 }
 0x17d   : > { %v1152_v11 = vpop.f32.mrf.mxu3  ;;  %1339 = vst [vmem:[%s1936_s7 + $0x30] sm:$0xff] %v1323_v6  ;;  %v1354_v1 = vadd.f32 %v1353_v22, %v1323_v6  ;;  %v1376_v21 = vmul.f32 %v1323_v6, %v1323_v6  ;;  %v1060_v12 = vadd.f32 %v1030_v10, %v935_v31 }
 0x17e   : > { %v908_v15 = vpop.f32.mrf.mxu1 }
 0x17f   : > { %v1391_v19 = vadd.f32 %v1390_v38, %v1376_v21  ;;  %v1182_v24 = vadd.f32 %v1152_v11, %v1060_v12  ;;  %v1277_v23 = vpop.f32.mrf.mxu0  ;;  %v936_v8 = vadd.f32 %v908_v15, %v2227_v7 }
 0x181   : > { %v1304_v53 = vadd.f32 %v1274_v5, %v1182_v24 }
 0x183   : > { %v1324_v34 = vadd.f32 %v2281_v45, %v1304_v53 }
 0x184   : > { %v1033_v54 = vpop.f32.mrf.mxu2 }
 0x185   : > { %v1155_v26 = vpop.f32.mrf.mxu3  ;;  %1340 = vst [vmem:[%s1936_s7 + $0x38] sm:$0xff] %v1324_v34  ;;  %v1355_v42 = vadd.f32 %v1354_v1, %v1324_v34  ;;  %v1377_v14 = vmul.f32 %v1324_v34, %v1324_v34  ;;  %v1061_v30 = vadd.f32 %v1033_v54, %v936_v8 }
 0x186   : > { %v910_v27 = vpop.f32.mrf.mxu1 }
 0x187   : > { %v1392_v33 = vadd.f32 %v1391_v19, %v1377_v14  ;;  %v1183_v39 = vadd.f32 %v1155_v26, %v1061_v30  ;;  %v1279_v43 = vpop.f32.mrf.mxu0  ;;  %v937_v16 = vadd.f32 %v910_v27, %v2236_v20 }
 0x189   : > { %v1305_v29 = vadd.f32 %v1277_v23, %v1183_v39 }
 0x18b   : > { %v1325_v46 = vadd.f32 %v2281_v45, %v1305_v29 }
 0x18c   : > { %v1035_v49 = vpop.f32.mrf.mxu2 }
 0x18d   : > { %v1157_v50 = vpop.f32.mrf.mxu3  ;;  %1341 = vst [vmem:[%s1936_s7 + $0x40] sm:$0xff] %v1325_v46  ;;  %v1356_v7 = vadd.f32 %v1355_v42, %v1325_v46  ;;  %v1378_v41 = vmul.f32 %v1325_v46, %v1325_v46  ;;  %v1062_v51 = vadd.f32 %v1035_v49, %v937_v16 }
 0x18e   : > { %v913_v52 = vpop.f32.mrf.mxu1 }
 0x18f   : > { %v1393_v32 = vadd.f32 %v1392_v33, %v1378_v41  ;;  %v1184_v60 = vadd.f32 %v1157_v50, %v1062_v51  ;;  %v1282_v55 = vpop.f32.mrf.mxu0  ;;  %v938_v13 = vadd.f32 %v913_v52, %v2241_v17 }
 0x191   : > { %v1306_v56 = vadd.f32 %v1279_v43, %v1184_v60 }
 0x193   : > { %v1326_v59 = vadd.f32 %v2281_v45, %v1306_v56 }
 0x194   : > { %v1038_v57 = vpop.f32.mrf.mxu2 }
 0x195   : > { %v1160_v40 = vpop.f32.mrf.mxu3  ;;  %1342 = vst [vmem:[%s1936_s7 + $0x48] sm:$0xff] %v1326_v59  ;;  %v1357_v20 = vadd.f32 %v1356_v7, %v1326_v59  ;;  %v1379_v58 = vmul.f32 %v1326_v59, %v1326_v59  ;;  %v1063_v61 = vadd.f32 %v1038_v57, %v938_v13 }
 0x196   : > { %v915_v62 = vpop.f32.mrf.mxu1 }
 0x197   : > { %v1394_v63 = vadd.f32 %v1393_v32, %v1379_v58  ;;  %v1185_v47 = vadd.f32 %v1160_v40, %v1063_v61  ;;  %v1284_v35 = vpop.f32.mrf.mxu0  ;;  %v939_v22 = vadd.f32 %v915_v62, %v2252_v44 }
 0x199   : > { %v1307_v36 = vadd.f32 %v1282_v55, %v1185_v47 }
 0x19b   : > { %v1327_v0 = vadd.f32 %v2281_v45, %v1307_v36 }
 0x19c   : > { %v1040_v3 = vpop.f32.mrf.mxu2 }
 0x19d   : > { %v1162_v37 = vpop.f32.mrf.mxu3  ;;  %1343 = vst [vmem:[%s1936_s7 + $0x50] sm:$0xff] %v1327_v0  ;;  %v1358_v17 = vadd.f32 %v1357_v20, %v1327_v0  ;;  %v1380_v4 = vmul.f32 %v1327_v0, %v1327_v0  ;;  %v1064_v38 = vadd.f32 %v1040_v3, %v939_v22 }
 0x19e   : > { %v918_v2 = vpop.f32.mrf.mxu1 }
 0x19f   : > { %v1395_v5 = vadd.f32 %v1394_v63, %v1380_v4  ;;  %v1186_v9 = vadd.f32 %v1162_v37, %v1064_v38  ;;  %v1287_v31 = vpop.f32.mrf.mxu0  ;;  %v940_v11 = vadd.f32 %v918_v2, %v2257_v48 }
 0x1a1   : > { %v1308_v6 = vadd.f32 %v1284_v35, %v1186_v9 }
 0x1a3   : > { %v1328_v10 = vadd.f32 %v2281_v45, %v1308_v6 }
 0x1a4   : > { %v1043_v1 = vpop.f32.mrf.mxu2 }
 0x1a5   : > { %v1165_v21 = vpop.f32.mrf.mxu3  ;;  %1344 = vst [vmem:[%s1936_s7 + $0x58] sm:$0xff] %v1328_v10  ;;  %v1359_v44 = vadd.f32 %v1358_v17, %v1328_v10  ;;  %v1381_v12 = vmul.f32 %v1328_v10, %v1328_v10  ;;  %v1065_v15 = vadd.f32 %v1043_v1, %v940_v11 }
 0x1a6   : > { %v920_v19 = vpop.f32.mrf.mxu1 }
 0x1a7   : > { %v1396_v24 = vadd.f32 %v1395_v5, %v1381_v12  ;;  %v1187_v23 = vadd.f32 %v1165_v21, %v1065_v15  ;;  %v941_v8 = vadd.f32 %v920_v19, %v2268_v25  ;;  %v1289_v54 = vpop.f32.mrf.mxu0 }
 0x1a9   : > { %v1309_v53 = vadd.f32 %v1287_v31, %v1187_v23 }
 0x1ab   : > { %v1329_v34 = vadd.f32 %v2281_v45, %v1309_v53 }
 0x1ac   : > { %v1045_v26 = vpop.f32.mrf.mxu2 }
 0x1ad   : > { %v1167_v42 = vpop.f32.mrf.mxu3  ;;  %1345 = vst [vmem:[%s1936_s7 + $0x60] sm:$0xff] %v1329_v34  ;;  %v1360_v48 = vadd.f32 %v1359_v44, %v1329_v34  ;;  %v1382_v14 = vmul.f32 %v1329_v34, %v1329_v34  ;;  %v1066_v30 = vadd.f32 %v1045_v26, %v941_v8 }
 0x1ae   : > { %v923_v27 = vpop.f32.mrf.mxu1 }
 0x1af   : > { %v1397_v33 = vadd.f32 %v1396_v24, %v1382_v14  ;;  %v1188_v39 = vadd.f32 %v1167_v42, %v1066_v30  ;;  %v942_v46 = vadd.f32 %v923_v27, %v2272_v28  ;;  %v1292_v41 = vpop.f32.mrf.mxu0 }
 0x1b1   : > { %v1310_v43 = vadd.f32 %v1289_v54, %v1188_v39 }
 0x1b3   : > { %v1330_v29 = vadd.f32 %v2281_v45, %v1310_v43 }
 0x1b4   : > { %v1048_v16 = vpop.f32.mrf.mxu2 }
 0x1b5   : > { %v1170_v49 = vpop.f32.mrf.mxu3  ;;  %1346 = vst [vmem:[%s1936_s7 + $0x68] sm:$0xff] %v1330_v29  ;;  %v1361_v25 = vadd.f32 %v1360_v48, %v1330_v29  ;;  %v1383_v50 = vmul.f32 %v1330_v29, %v1330_v29  ;;  %v1067_v7 = vadd.f32 %v1048_v16, %v942_v46 }
 0x1b6   : > { %v925_v32 = vpop.f32.mrf.mxu1 }
 0x1b7   : > { %v1398_v51 = vadd.f32 %v1397_v33, %v1383_v50  ;;  %v1189_v52 = vadd.f32 %v1170_v49, %v1067_v7  ;;  %v943_v56 = vadd.f32 %v925_v32, %v2275_v18  ;;  %v1294_v61 = vpop.f32.mrf.mxu0 }
 0x1b9   : > { %v1311_v60 = vadd.f32 %v1292_v41, %v1189_v52 }
 0x1bb   : > { %v1331_v55 = vadd.f32 %v2281_v45, %v1311_v60 }
 0x1bc   : > { %v1050_v59 = vpop.f32.mrf.mxu2 }
 0x1bd   : > { %1347 = vst [vmem:[%s1936_s7 + $0x70] sm:$0xff] %v1331_v55  ;;  %v1362_v13 = vadd.f32 %v1361_v25, %v1331_v55  ;;  %v1384_v28 = vmul.f32 %v1331_v55, %v1331_v55  ;;  %v1068_v57 = vadd.f32 %v1050_v59, %v943_v56  ;;  %v1172_v40 = vpop.f32.mrf.mxu3 }
 0x1bf   : > { %v1399_v20 = vadd.f32 %v1398_v51, %v1384_v28  ;;  %v1190_v58 = vadd.f32 %v1172_v40, %v1068_v57 }
 0x1c1   : > { %v1312_v62 = vadd.f32 %v1294_v61, %v1190_v58 }
 0x1c3   : > { %v1332_v63 = vadd.f32 %v2281_v45, %v1312_v62  ;;  %v1407_v45 = vld [vmem:[%s1941_s10] sm:$0x3] }
 0x1c5   : > { %1348 = vst [vmem:[%s1936_s7 + $0x78] sm:$0xff] %v1332_v63  ;;  %v1363_v47 = vadd.f32 %v1362_v13, %v1332_v63  ;;  %v1385_v35 = vmul.f32 %v1332_v63, %v1332_v63 }
 0x1c7   : > { %v1364_v36 = vrot.slane %v1363_v47, 4  ;;  %v1400_v0 = vadd.f32 %v1399_v20, %v1385_v35 }
 0x1c9   : > { %v1365_v18 = vadd.f32 %v1364_v36, %v1363_v47  ;;  %v1401_v22 = vrot.slane %v1400_v0, 4 }
 0x1cb   : > { %v1366_v3 = vrot.slane %v1365_v18, 2  ;;  %v1402_v37 = vadd.f32 %v1401_v22, %v1400_v0 }
 0x1cd   : > { %v1367_v17 = vadd.f32 %v1366_v3, %v1365_v18  ;;  %v1403_v4 = vrot.slane %v1402_v37, 2 }
 0x1cf   : > { %v1368_v38 = vrot.slane %v1367_v17, 1  ;;  %v1404_v2 = vadd.f32 %v1403_v4, %v1402_v37 }
 0x1d1   : > { %v1405_v5 = vrot.slane %v1404_v2, 1  ;;  %v1369_v9 = vadd.f32 %v1368_v38, %v1367_v17 }
 0x1d3   : > { %v1406_v6 = vadd.f32 %v1405_v5, %v1404_v2 }
 0x1d5   : > { %v1409_v31 = vsel %vm1408_vm1, %v1369_v9, %v1406_v6 }
 0x1d6   : > { %v1410_v10 = vadd.f32 %v1409_v31, %v1407_v45 }
 0x1d8   : > { %1411 = vst [vmem:[%s1941_s10] sm:$0x3] %v1410_v10 }
 0x1d9 PF: > { %s15_s19 = sadd.s32 1, %s1869_s19   ;;  %s2352_s15 = smov %s1861_s17 }
 0x1da   : > { %p12_p8 = scmp.ge.s32.totalorder %s15_s19, 6   ;;  %s2353_s16 = smov %s1865_s18 }
 0x1db   : > { %s2354_s17 = smov %s2357_s20  ;;  %s2355_s18 = smov %s2361_s21 }
 0x1dc   :  { %14 = sbr.rel (!%p12_p8) target bundleno = 3 (0x3), region = 89 }

</bundles_post_ra>
